<compile_context>
chip_gen: v7x
topology: tpu7x:2x2x1
jax: 0.10.0
libtpu: 0.0.40
codegen_flags: <defaults>
</compile_context>

<pallas_src>
import functools

import jax
import jax.numpy as jnp
from jax import lax
from jax.experimental import pallas as pl
from jax.experimental.pallas import tpu as pltpu


def _mm(a_hi, a_lo, b_hi, b_lo):
    """a @ b with f32 accumulation.  lo parts (bf16 residuals) are optional;
    when present the product is hi@hi + hi@lo + lo@hi ("bf16x3"), keeping
    ~f32 accuracy while every MXU pass uses bf16 operands."""
    acc = jnp.dot(a_hi, b_hi, preferred_element_type=jnp.float32)
    if b_lo is not None:
        acc = acc + jnp.dot(a_hi, b_lo, preferred_element_type=jnp.float32)
    if a_lo is not None:
        acc = acc + jnp.dot(a_lo, b_hi, preferred_element_type=jnp.float32)
    return acc


def _split_bf16(x):
    hi = x.astype(jnp.bfloat16)
    lo = (x - hi.astype(jnp.float32)).astype(jnp.bfloat16)
    return hi, lo


def _ff_loss_kernel(*refs, cb, h, w, alpha, log_matrix, split):
    """One grid step = one block of cb channels of mean_N(pred - target).

    Ref layout (split=True adds the bf16 residual "lo" parts):
      lh[, lh_lo] : (2H, H)    [Cc ; Cs] column-DFT matrix (ortho)
      rw[, rw_lo] : (2, W, W)  stacked [Wc, Ws] row-DFT matrices (ortho)
      d [, d_lo]  : (cb, H, W) batch-mean difference block
      out         : (1, 8, 128) lane-dense tile with this block's partial loss
      tp, tq      : (cb*H, W) f32 VMEM scratch for the row-transform outputs
    """
    if split:
        (lh_hi_ref, lh_lo_ref, rw_hi_ref, rw_lo_ref, d_hi_ref, d_lo_ref,
         out_ref, tp_ref, tq_ref) = refs
    else:
        lh_hi_ref, rw_hi_ref, d_hi_ref, out_ref, tp_ref, tq_ref = refs
        lh_lo_ref = rw_lo_ref = d_lo_ref = None

    # Row (W) transform for all cb channels in one (or three) MXU op(s).
    # (cb,H,W)->(cb*H,W) merges channels into sublanes: free when H is a
    # multiple of the sublane tile, a small relayout copy otherwise.
    x_hi = d_hi_ref[...].reshape(cb * h, w)
    x_lo = d_lo_ref[...].reshape(cb * h, w) if split else None
    wc_hi, ws_hi = rw_hi_ref[0], rw_hi_ref[1]
    wc_lo = rw_lo_ref[0] if split else None
    ws_lo = rw_lo_ref[1] if split else None
    # P = X @ Wc, Q = X @ Ws  (row DFT is P - i*Q).  Kept as two separate
    # (.., W) results so no lane-misaligned P|Q slicing is ever needed.
    tp_ref[...] = _mm(x_hi, x_lo, wc_hi, wc_lo)
    tq_ref[...] = _mm(x_hi, x_lo, ws_hi, ws_lo)

    lh_hi = lh_hi_ref[...]
    lh_lo = lh_lo_ref[...] if split else None
    mm_dtype = lh_hi.dtype

    def channel_body(c, total):
        start = c * h
        if h % 8 == 0:
            start = pl.multiple_of(start, 8)
        p = tp_ref[pl.ds(start, h), :]                    # (H, W) f32
        q = tq_ref[pl.ds(start, h), :]
        if split:
            p_hi, p_lo = _split_bf16(p)
            q_hi, q_lo = _split_bf16(q)
        else:
            p_hi, p_lo = p.astype(mm_dtype), None
            q_hi, q_lo = q.astype(mm_dtype), None
        # Column (H) transform, Cc/Cs fused along rows (sublane-aligned split):
        #   Rp = [Cc;Cs] @ P,  Rq = [Cc;Cs] @ Q
        rp = _mm(lh_hi, lh_lo, p_hi, p_lo)                # (2H, W) f32
        rq = _mm(lh_hi, lh_lo, q_hi, q_lo)
        # Y = (Cc - i Cs)(P - i Q):  Re = CcP - CsQ,  Im = -(CcQ + CsP)
        y_re = rp[:h, :] - rq[h:, :]
        y_im = rq[:h, :] + rp[h:, :]                      # sign irrelevant
        fd = y_re * y_re + y_im * y_im                    # (H, W) freq distance

        wgt = jnp.sqrt(fd)
        if alpha != 1.0:
            wgt = wgt ** alpha
        if log_matrix:
            wgt = jnp.log1p(wgt)
        # batch_matrix=False + ave_spectrum=True: per-channel max over (H, W).
        # max + EUP reciprocal + min replaces divide + isnan fixup + clip.
        mx = jnp.max(wgt, keepdims=True)                  # (1, 1)
        inv = jnp.where(mx > 0.0, pl.reciprocal(mx, approx=True),
                        jnp.float32(0.0))
        wgt = jnp.minimum(wgt * inv, 1.0)
        return total + jnp.sum(wgt * fd)

    total = lax.fori_loop(0, cb, channel_body, jnp.float32(0.0),
                          unroll=(cb <= 4))
    out_ref[...] = jnp.full(out_ref.shape, total, dtype=jnp.float32)


def _dft_matrices(n):
    """Ortho DFT: F[u,k] = exp(-2*pi*i*u*k/n)/sqrt(n) = (cos - i*sin)/sqrt(n).
    Phase built from the exact integer (u*k) mod n so it stays accurate for
    large n (an f32 outer product loses accuracy past n ~ 512)."""
    assert n <= 46340, "u*k would overflow int32"
    k = jnp.arange(n, dtype=jnp.int32)
    idx = (k[:, None] * k[None, :]) % n
    ang = (2.0 * jnp.pi / n) * idx.astype(jnp.float32)
    scale = jnp.float32(1.0 / (float(n) ** 0.5))
    return jnp.cos(ang) * scale, jnp.sin(ang) * scale


def _step_vmem_bytes(cb, h, w, n_parts, in_bytes):
    """Estimated per-grid-step VMEM footprint (budget the REAL footprint, not
    just the input slab)."""
    dft = n_parts * (2 * h * h + 2 * w * w) * in_bytes    # lh + rw, 1x buffered
    d_blk = 2 * n_parts * cb * h * w * in_bytes           # 2x-buffered input block
    scratch = 2 * cb * h * w * 4                          # tp, tq (f32)
    live = 2 * (2 * h) * w * 4 + 4 * h * w * 4            # rp, rq, y/fd/wgt temps
    if n_parts == 2:
        live += 4 * h * w * 2                             # p/q hi+lo bf16 splits
    out = 2 * 8 * 128 * 4
    return int(1.1 * (dft + d_blk + scratch + live + out)) + (1 << 20)


def _tpu_vmem_info():
    """(vmem_capacity_bytes, prefer_even_grid).  Among the targets, v7x is the
    only chip with 64 MiB/TC VMEM and the only one with 2 TensorCores, so a
    small capacity doubles as the 'balance the grid across cores' signal."""
    try:
        cap = int(pltpu.get_tpu_info().vmem_capacity_bytes)
    except Exception:
        cap = 64 << 20                    # conservative (v7x-sized) fallback
    return cap, cap <= (96 << 20)


def _pick_channel_block(c, h, w, n_parts, in_bytes, budget, prefer_even_grid):
    """Channels per grid step: largest divisor of C whose per-step footprint
    fits the VMEM budget.  Single-core chips (v5e/v6e) happily take nb == 1;
    on v7x prefer an even grid so both TensorCores get equal work, but never
    at the cost of dropping the row-matmul M dim (cb*H) below the MXU height."""
    divisors = [d for d in range(1, c + 1) if c % d == 0]
    feasible = [d for d in divisors
                if _step_vmem_bytes(d, h, w, n_parts, in_bytes) <= budget]
    if not feasible:
        feasible = [1]
    best = max(feasible)
    if prefer_even_grid:
        even = [d for d in feasible if (c // d) % 2 == 0]
        if even and max(even) * h >= 256:
            best = max(even)
    return best


def _const_spec(block_shape):
    """BlockSpec for a grid-invariant input: single-buffered (its block index
    never changes, so double-buffering only burns VMEM)."""
    index_map = lambda i: (0,) * len(block_shape)
    try:
        return pl.BlockSpec(block_shape, index_map,
                            pipeline_mode=pl.Buffered(1))
    except TypeError:   # older JAX without pipeline_mode: default buffering
        return pl.BlockSpec(block_shape, index_map)


def ff_loss_pallas(pred, target, *, loss_weight=1.0, alpha=1.0, patch_factor=1,
                   ave_spectrum=True, log_matrix=False, batch_matrix=False,
                   precision="bf16x3"):
    """Focal Frequency Loss forward pass (PyTorch-module defaults).

    precision: "bf16x3" (default: bf16 MXU operands with hi/lo split, ~f32
               accuracy), "bf16" (fastest, single bf16 pass), "f32" (exact).
    """
    # TODO(synk): patch_factor > 1 patch cropping not implemented
    assert patch_factor == 1
    # TODO(synk): ave_spectrum=False (per-sample spectra) not implemented
    assert ave_spectrum
    # TODO(synk): batch_matrix=True (global-max normalization) not implemented
    assert not batch_matrix
    assert precision in ("bf16x3", "bf16", "f32")

    N, C, H, W = pred.shape

    # Exact rewrite: the loss only uses recon_freq - real_freq, and both the
    # FFT and the batch mean are linear, so FFT(mean_N pred) - FFT(mean_N tgt)
    # == FFT(mean_N(pred - target)).  Feed one (C, H, W) slab to the kernel.
    # TODO(synk): for very large N the HBM-bound reduction below could be
    # folded into the kernel via an extra "arbitrary" grid axis.
    d = jnp.mean(pred.astype(jnp.float32) - target.astype(jnp.float32), axis=0)

    cc, cs = _dft_matrices(H)
    wc, ws = _dft_matrices(W)
    lh = jnp.concatenate([cc, cs], axis=0)          # (2H, H)   [Cc ; Cs]
    rw = jnp.stack([wc, ws], axis=0)                # (2, W, W) [Wc, Ws]

    split = precision == "bf16x3"
    if precision == "f32":
        lh_parts, rw_parts, d_parts = (lh,), (rw,), (d,)
        n_parts, in_bytes = 1, 4
    elif precision == "bf16":
        lh_parts = (lh.astype(jnp.bfloat16),)
        rw_parts = (rw.astype(jnp.bfloat16),)
        d_parts = (d.astype(jnp.bfloat16),)
        n_parts, in_bytes = 1, 2
    else:  # "bf16x3"
        lh_parts, rw_parts, d_parts = _split_bf16(lh), _split_bf16(rw), _split_bf16(d)
        n_parts, in_bytes = 2, 2

    vmem_cap, prefer_even = _tpu_vmem_info()
    budget = min(40 << 20, int(0.4 * vmem_cap))     # ~40 MiB v5e/v6e, ~25 MiB v7x
    cb = _pick_channel_block(C, H, W, n_parts, in_bytes, budget, prefer_even)
    nb = C // cb
    footprint = _step_vmem_bytes(cb, H, W, n_parts, in_bytes)
    vmem_limit = int(min(int(vmem_cap * 0.9),
                         max(int(footprint * 1.3), 32 << 20)))

    kernel = functools.partial(_ff_loss_kernel, cb=cb, h=H, w=W,
                               alpha=float(alpha), log_matrix=bool(log_matrix),
                               split=split)

    lh_spec = _const_spec((2 * H, H))
    rw_spec = _const_spec((2, W, W))
    d_spec = pl.BlockSpec((cb, H, W), lambda i: (i, 0, 0))
    in_specs = ([lh_spec] * len(lh_parts) + [rw_spec] * len(rw_parts)
                + [d_spec] * len(d_parts))
    args = (*lh_parts, *rw_parts, *d_parts)

    flops = n_parts * (4 * C * H * W * W + 8 * C * H * H * W)
    bytes_accessed = (sum(int(a.size) * a.dtype.itemsize for a in args)
                      + nb * 8 * 128 * 4)
    cost = pl.CostEstimate(flops=int(flops), transcendentals=int(C * H * W),
                           bytes_accessed=int(bytes_accessed))

    out = pl.pallas_call(
        kernel,
        out_shape=jax.ShapeDtypeStruct((nb, 8, 128), jnp.float32),
        grid_spec=pltpu.PrefetchScalarGridSpec(
            num_scalar_prefetch=0,
            grid=(nb,),
            in_specs=in_specs,
            out_specs=pl.BlockSpec((1, 8, 128), lambda i: (i, 0, 0)),
            scratch_shapes=[pltpu.VMEM((cb * H, W), jnp.float32),   # P = X @ Wc
                            pltpu.VMEM((cb * H, W), jnp.float32)],  # Q = X @ Ws
        ),
        compiler_params=pltpu.CompilerParams(
            dimension_semantics=("parallel",),
            vmem_limit_bytes=vmem_limit),
        cost_estimate=cost,
    )(*args)

    per_block = out[:, 0, 0]                        # (nb,) partial sums
    # mean over the (1, 1, C, H, W) loss tensor, then *50 and *loss_weight
    loss = jnp.sum(per_block) / jnp.float32(C * H * W)
    return loss * 50.0 * loss_weight


def ff_loss_reference(pred, target, *, loss_weight=1.0, alpha=1.0):
    """Pure-JAX reference mirroring the PyTorch module (defaults)."""
    pred = pred.astype(jnp.float32)
    target = target.astype(jnp.float32)

    def tensor2freq(x):
        y = x[:, None]                              # (N, 1, C, H, W)  (patch_factor=1)
        f = jnp.fft.fft2(y, norm="ortho")
        return jnp.stack([f.real, f.imag], -1)      # (N, 1, C, H, W, 2)

    pf = jnp.mean(tensor2freq(pred), axis=0, keepdims=True)
    tf_ = jnp.mean(tensor2freq(target), axis=0, keepdims=True)

    d2 = (pf - tf_) ** 2
    freq_dist = d2[..., 0] + d2[..., 1]
    w = jnp.sqrt(freq_dist) ** alpha
    w = w / jnp.max(w, axis=(-2, -1), keepdims=True)
    w = jnp.where(jnp.isnan(w), 0.0, w)
    w = jnp.clip(w, 0.0, 1.0)
    return jnp.mean(w * freq_dist) * 50.0 * loss_weight


if __name__ == "__main__":
    key = jax.random.PRNGKey(0)
    k1, k2 = jax.random.split(key)
    pred = jax.random.normal(k1, (2, 4, 16, 16), dtype=jnp.float32)
    target = jax.random.normal(k2, (2, 4, 16, 16), dtype=jnp.float32)

    loss = jax.block_until_ready(ff_loss_pallas(pred, target))
    ref = ff_loss_reference(pred, target)
    assert jnp.allclose(loss, ref, rtol=1e-2, atol=1e-4), (float(loss), float(ref))

    print("KERNEL_OK")
</pallas_src>

<mosaic_0001>
module attributes {stable_mosaic.version = 11 : i64} {
  func.func @_ff_loss_kernel(%arg0: i32, %arg1: memref<32x16xbf16, #tpu.memory_space<vmem>>, %arg2: memref<32x16xbf16, #tpu.memory_space<vmem>>, %arg3: memref<2x16x16xbf16, #tpu.memory_space<vmem>>, %arg4: memref<2x16x16xbf16, #tpu.memory_space<vmem>>, %arg5: memref<4x16x16xbf16, #tpu.memory_space<vmem>>, %arg6: memref<4x16x16xbf16, #tpu.memory_space<vmem>>, %arg7: memref<1x8x128xf32, #tpu.memory_space<vmem>>, %arg8: memref<64x16xf32, #tpu.memory_space<vmem>>, %arg9: memref<64x16xf32, #tpu.memory_space<vmem>>) attributes {dimension_semantics = [#tpu.dimension_semantics<parallel>], iteration_bounds = array<i64: 1>, scalar_prefetch = 0 : i64, scratch_operands = 2 : i64, tpu.core_type = #tpu.core_type<tc>, window_params = [{pipeline_mode = #tpu.pipeline_mode<synchronous>, transform_indices = @transform_0, window_bounds = array<i64: 32, 16>}, {pipeline_mode = #tpu.pipeline_mode<synchronous>, transform_indices = @transform_1, window_bounds = array<i64: 32, 16>}, {pipeline_mode = #tpu.pipeline_mode<synchronous>, transform_indices = @transform_2, window_bounds = array<i64: 2, 16, 16>}, {pipeline_mode = #tpu.pipeline_mode<synchronous>, transform_indices = @transform_3, window_bounds = array<i64: 2, 16, 16>}, {transform_indices = @transform_4, window_bounds = array<i64: 4, 16, 16>}, {transform_indices = @transform_5, window_bounds = array<i64: 4, 16, 16>}, {transform_indices = @transform_6, window_bounds = array<i64: 1, 8, 128>}]} {
    %c0 = arith.constant 0 : index
    %c0_0 = arith.constant 0 : index
    %c0_1 = arith.constant 0 : index
    %0 = vector.load %arg5[%c0, %c0_0, %c0_1] : memref<4x16x16xbf16, #tpu.memory_space<vmem>>, vector<4x16x16xbf16>
    %1 = vector.shape_cast %0 : vector<4x16x16xbf16> to vector<64x16xbf16>
    %c0_2 = arith.constant 0 : index
    %c0_3 = arith.constant 0 : index
    %c0_4 = arith.constant 0 : index
    %2 = vector.load %arg6[%c0_2, %c0_3, %c0_4] : memref<4x16x16xbf16, #tpu.memory_space<vmem>>, vector<4x16x16xbf16>
    %3 = vector.shape_cast %2 : vector<4x16x16xbf16> to vector<64x16xbf16>
    %c0_5 = arith.constant 0 : index
    %c0_6 = arith.constant 0 : index
    %c0_7 = arith.constant 0 : index
    %4 = vector.load %arg3[%c0_5, %c0_6, %c0_7] : memref<2x16x16xbf16, #tpu.memory_space<vmem>>, vector<1x16x16xbf16>
    %5 = vector.shape_cast %4 : vector<1x16x16xbf16> to vector<16x16xbf16>
    %c1 = arith.constant 1 : index
    %c0_8 = arith.constant 0 : index
    %c0_9 = arith.constant 0 : index
    %6 = vector.load %arg3[%c1, %c0_8, %c0_9] : memref<2x16x16xbf16, #tpu.memory_space<vmem>>, vector<1x16x16xbf16>
    %7 = vector.shape_cast %6 : vector<1x16x16xbf16> to vector<16x16xbf16>
    %c0_10 = arith.constant 0 : index
    %c0_11 = arith.constant 0 : index
    %c0_12 = arith.constant 0 : index
    %8 = vector.load %arg4[%c0_10, %c0_11, %c0_12] : memref<2x16x16xbf16, #tpu.memory_space<vmem>>, vector<1x16x16xbf16>
    %9 = vector.shape_cast %8 : vector<1x16x16xbf16> to vector<16x16xbf16>
    %c1_13 = arith.constant 1 : index
    %c0_14 = arith.constant 0 : index
    %c0_15 = arith.constant 0 : index
    %10 = vector.load %arg4[%c1_13, %c0_14, %c0_15] : memref<2x16x16xbf16, #tpu.memory_space<vmem>>, vector<1x16x16xbf16>
    %11 = vector.shape_cast %10 : vector<1x16x16xbf16> to vector<16x16xbf16>
    %cst = arith.constant dense<0.000000e+00> : vector<64x16xf32>
    %12 = tpu.matmul %1, %5, %cst {dimension_numbers = #tpu.dot_dimension_numbers<[1], [0], [0], [1], [0, 0, 1, 1], [], []>} : vector<64x16xbf16>, vector<16x16xbf16>, vector<64x16xf32> -> vector<64x16xf32>
    %cst_16 = arith.constant dense<0.000000e+00> : vector<64x16xf32>
    %13 = tpu.matmul %1, %9, %cst_16 {dimension_numbers = #tpu.dot_dimension_numbers<[1], [0], [0], [1], [0, 0, 1, 1], [], []>} : vector<64x16xbf16>, vector<16x16xbf16>, vector<64x16xf32> -> vector<64x16xf32>
    %14 = arith.addf %12, %13 : vector<64x16xf32>
    %cst_17 = arith.constant dense<0.000000e+00> : vector<64x16xf32>
    %15 = tpu.matmul %3, %5, %cst_17 {dimension_numbers = #tpu.dot_dimension_numbers<[1], [0], [0], [1], [0, 0, 1, 1], [], []>} : vector<64x16xbf16>, vector<16x16xbf16>, vector<64x16xf32> -> vector<64x16xf32>
    %16 = arith.addf %14, %15 : vector<64x16xf32>
    %c0_18 = arith.constant 0 : index
    %c0_19 = arith.constant 0 : index
    %17 = vector.load %arg8[%c0_18, %c0_19] : memref<64x16xf32, #tpu.memory_space<vmem>>, vector<64x16xf32>
    tpu.vector_store %arg8[%c0_18, %c0_19], %16 {strides = array<i32>} : memref<64x16xf32, #tpu.memory_space<vmem>>, vector<64x16xf32>,
    %cst_20 = arith.constant dense<0.000000e+00> : vector<64x16xf32>
    %18 = tpu.matmul %1, %7, %cst_20 {dimension_numbers = #tpu.dot_dimension_numbers<[1], [0], [0], [1], [0, 0, 1, 1], [], []>} : vector<64x16xbf16>, vector<16x16xbf16>, vector<64x16xf32> -> vector<64x16xf32>
    %cst_21 = arith.constant dense<0.000000e+00> : vector<64x16xf32>
    %19 = tpu.matmul %1, %11, %cst_21 {dimension_numbers = #tpu.dot_dimension_numbers<[1], [0], [0], [1], [0, 0, 1, 1], [], []>} : vector<64x16xbf16>, vector<16x16xbf16>, vector<64x16xf32> -> vector<64x16xf32>
    %20 = arith.addf %18, %19 : vector<64x16xf32>
    %cst_22 = arith.constant dense<0.000000e+00> : vector<64x16xf32>
    %21 = tpu.matmul %3, %7, %cst_22 {dimension_numbers = #tpu.dot_dimension_numbers<[1], [0], [0], [1], [0, 0, 1, 1], [], []>} : vector<64x16xbf16>, vector<16x16xbf16>, vector<64x16xf32> -> vector<64x16xf32>
    %22 = arith.addf %20, %21 : vector<64x16xf32>
    %c0_23 = arith.constant 0 : index
    %c0_24 = arith.constant 0 : index
    %23 = vector.load %arg9[%c0_23, %c0_24] : memref<64x16xf32, #tpu.memory_space<vmem>>, vector<64x16xf32>
    tpu.vector_store %arg9[%c0_23, %c0_24], %22 {strides = array<i32>} : memref<64x16xf32, #tpu.memory_space<vmem>>, vector<64x16xf32>,
    %c0_25 = arith.constant 0 : index
    %c0_26 = arith.constant 0 : index
    %24 = vector.load %arg1[%c0_25, %c0_26] : memref<32x16xbf16, #tpu.memory_space<vmem>>, vector<32x16xbf16>
    %c0_27 = arith.constant 0 : index
    %c0_28 = arith.constant 0 : index
    %25 = vector.load %arg2[%c0_27, %c0_28] : memref<32x16xbf16, #tpu.memory_space<vmem>>, vector<32x16xbf16>
    %cst_29 = arith.constant 0.000000e+00 : f32
    %c0_i32 = arith.constant 0 : i32
    %c16_i32 = arith.constant 16 : i32
    %26 = arith.muli %c0_i32, %c16_i32 : i32
    %27 = tpu.assume_multiple %26, 8 : i32
    %28 = arith.index_cast %27 : i32 to index
    %c0_30 = arith.constant 0 : index
    %29 = vector.load %arg8[%28, %c0_30] : memref<64x16xf32, #tpu.memory_space<vmem>>, vector<16x16xf32>
    %30 = arith.index_cast %27 : i32 to index
    %c0_31 = arith.constant 0 : index
    %31 = vector.load %arg9[%30, %c0_31] : memref<64x16xf32, #tpu.memory_space<vmem>>, vector<16x16xf32>
    %32 = arith.truncf %29 : vector<16x16xf32> to vector<16x16xbf16>
    %33 = arith.extf %32 : vector<16x16xbf16> to vector<16x16xf32>
    %34 = arith.subf %29, %33 : vector<16x16xf32>
    %35 = arith.truncf %34 : vector<16x16xf32> to vector<16x16xbf16>
    %36 = arith.truncf %31 : vector<16x16xf32> to vector<16x16xbf16>
    %37 = arith.extf %36 : vector<16x16xbf16> to vector<16x16xf32>
    %38 = arith.subf %31, %37 : vector<16x16xf32>
    %39 = arith.truncf %38 : vector<16x16xf32> to vector<16x16xbf16>
    %cst_32 = arith.constant dense<0.000000e+00> : vector<32x16xf32>
    %40 = tpu.matmul %24, %32, %cst_32 {dimension_numbers = #tpu.dot_dimension_numbers<[1], [0], [0], [1], [0, 0, 1, 1], [], []>} : vector<32x16xbf16>, vector<16x16xbf16>, vector<32x16xf32> -> vector<32x16xf32>
    %cst_33 = arith.constant dense<0.000000e+00> : vector<32x16xf32>
    %41 = tpu.matmul %24, %35, %cst_33 {dimension_numbers = #tpu.dot_dimension_numbers<[1], [0], [0], [1], [0, 0, 1, 1], [], []>} : vector<32x16xbf16>, vector<16x16xbf16>, vector<32x16xf32> -> vector<32x16xf32>
    %42 = arith.addf %40, %41 : vector<32x16xf32>
    %cst_34 = arith.constant dense<0.000000e+00> : vector<32x16xf32>
    %43 = tpu.matmul %25, %32, %cst_34 {dimension_numbers = #tpu.dot_dimension_numbers<[1], [0], [0], [1], [0, 0, 1, 1], [], []>} : vector<32x16xbf16>, vector<16x16xbf16>, vector<32x16xf32> -> vector<32x16xf32>
    %44 = arith.addf %42, %43 : vector<32x16xf32>
    %cst_35 = arith.constant dense<0.000000e+00> : vector<32x16xf32>
    %45 = tpu.matmul %24, %36, %cst_35 {dimension_numbers = #tpu.dot_dimension_numbers<[1], [0], [0], [1], [0, 0, 1, 1], [], []>} : vector<32x16xbf16>, vector<16x16xbf16>, vector<32x16xf32> -> vector<32x16xf32>
    %cst_36 = arith.constant dense<0.000000e+00> : vector<32x16xf32>
    %46 = tpu.matmul %24, %39, %cst_36 {dimension_numbers = #tpu.dot_dimension_numbers<[1], [0], [0], [1], [0, 0, 1, 1], [], []>} : vector<32x16xbf16>, vector<16x16xbf16>, vector<32x16xf32> -> vector<32x16xf32>
    %47 = arith.addf %45, %46 : vector<32x16xf32>
    %cst_37 = arith.constant dense<0.000000e+00> : vector<32x16xf32>
    %48 = tpu.matmul %25, %36, %cst_37 {dimension_numbers = #tpu.dot_dimension_numbers<[1], [0], [0], [1], [0, 0, 1, 1], [], []>} : vector<32x16xbf16>, vector<16x16xbf16>, vector<32x16xf32> -> vector<32x16xf32>
    %49 = arith.addf %47, %48 : vector<32x16xf32>
    %50 = vector.extract_strided_slice %44 {offsets = [0, 0], sizes = [16, 16], strides = [1, 1]} : vector<32x16xf32> to vector<16x16xf32>
    %51 = vector.extract_strided_slice %49 {offsets = [16, 0], sizes = [16, 16], strides = [1, 1]} : vector<32x16xf32> to vector<16x16xf32>
    %52 = arith.subf %50, %51 : vector<16x16xf32>
    %53 = vector.extract_strided_slice %49 {offsets = [0, 0], sizes = [16, 16], strides = [1, 1]} : vector<32x16xf32> to vector<16x16xf32>
    %54 = vector.extract_strided_slice %44 {offsets = [16, 0], sizes = [16, 16], strides = [1, 1]} : vector<32x16xf32> to vector<16x16xf32>
    %55 = arith.addf %53, %54 : vector<16x16xf32>
    %56 = arith.mulf %52, %52 : vector<16x16xf32>
    %57 = arith.mulf %55, %55 : vector<16x16xf32>
    %58 = arith.addf %56, %57 : vector<16x16xf32>
    %59 = math.sqrt %58 : vector<16x16xf32>
    %60 = vector.shape_cast %59 : vector<16x16xf32> to vector<1x16x16xf32>
    %cst_38 = arith.constant dense<0xFF800000> : vector<1xf32>
    %61 = vector.multi_reduction <maximumf>, %60, %cst_38 [1, 2] : vector<1x16x16xf32> to vector<1xf32>
    %62 = vector.shape_cast %61 : vector<1xf32> to vector<1x1x1xf32>
    %63 = vector.extract %62[0, 0, 0] : f32 from vector<1x1x1xf32>
    %64 = vector.broadcast %63 : f32 to vector<1x1xf32>
    %cst_39 = arith.constant 0.000000e+00 : f32
    %65 = vector.broadcast %cst_39 : f32 to vector<1x1xf32>
    %66 = arith.cmpf ogt, %64, %65 : vector<1x1xf32>
    %67 = tpu.reciprocal %64 {approx = true} : vector<1x1xf32> -> vector<1x1xf32>
    %cst_40 = arith.constant 0.000000e+00 : f32
    %68 = vector.broadcast %cst_40 : f32 to vector<1x1xf32>
    %69 = arith.select %66, %67, %68 : vector<1x1xi1>, vector<1x1xf32>
    %70 = vector.broadcast %69 : vector<1x1xf32> to vector<16x16xf32>
    %71 = arith.mulf %59, %70 : vector<16x16xf32>
    %cst_41 = arith.constant 1.000000e+00 : f32
    %72 = vector.broadcast %cst_41 : f32 to vector<16x16xf32>
    %73 = arith.minimumf %71, %72 : vector<16x16xf32>
    %74 = arith.mulf %73, %58 : vector<16x16xf32>
    %75 = vector.shape_cast %74 : vector<16x16xf32> to vector<1x16x16xf32>
    %cst_42 = arith.constant dense<0.000000e+00> : vector<1xf32>
    %76 = vector.multi_reduction <add>, %75, %cst_42 [1, 2] : vector<1x16x16xf32> to vector<1xf32>
    %77 = vector.shape_cast %76 : vector<1xf32> to vector<1x1x1xf32>
    %78 = vector.extract %77[0, 0, 0] : f32 from vector<1x1x1xf32>
    %79 = arith.addf %cst_29, %78 : f32
    %c1_i32 = arith.constant 1 : i32
    %c16_i32_43 = arith.constant 16 : i32
    %80 = arith.muli %c1_i32, %c16_i32_43 : i32
    %81 = tpu.assume_multiple %80, 8 : i32
    %82 = arith.index_cast %81 : i32 to index
    %c0_44 = arith.constant 0 : index
    %83 = vector.load %arg8[%82, %c0_44] : memref<64x16xf32, #tpu.memory_space<vmem>>, vector<16x16xf32>
    %84 = arith.index_cast %81 : i32 to index
    %c0_45 = arith.constant 0 : index
    %85 = vector.load %arg9[%84, %c0_45] : memref<64x16xf32, #tpu.memory_space<vmem>>, vector<16x16xf32>
    %86 = arith.truncf %83 : vector<16x16xf32> to vector<16x16xbf16>
    %87 = arith.extf %86 : vector<16x16xbf16> to vector<16x16xf32>
    %88 = arith.subf %83, %87 : vector<16x16xf32>
    %89 = arith.truncf %88 : vector<16x16xf32> to vector<16x16xbf16>
    %90 = arith.truncf %85 : vector<16x16xf32> to vector<16x16xbf16>
    %91 = arith.extf %90 : vector<16x16xbf16> to vector<16x16xf32>
    %92 = arith.subf %85, %91 : vector<16x16xf32>
    %93 = arith.truncf %92 : vector<16x16xf32> to vector<16x16xbf16>
    %cst_46 = arith.constant dense<0.000000e+00> : vector<32x16xf32>
    %94 = tpu.matmul %24, %86, %cst_46 {dimension_numbers = #tpu.dot_dimension_numbers<[1], [0], [0], [1], [0, 0, 1, 1], [], []>} : vector<32x16xbf16>, vector<16x16xbf16>, vector<32x16xf32> -> vector<32x16xf32>
    %cst_47 = arith.constant dense<0.000000e+00> : vector<32x16xf32>
    %95 = tpu.matmul %24, %89, %cst_47 {dimension_numbers = #tpu.dot_dimension_numbers<[1], [0], [0], [1], [0, 0, 1, 1], [], []>} : vector<32x16xbf16>, vector<16x16xbf16>, vector<32x16xf32> -> vector<32x16xf32>
    %96 = arith.addf %94, %95 : vector<32x16xf32>
    %cst_48 = arith.constant dense<0.000000e+00> : vector<32x16xf32>
    %97 = tpu.matmul %25, %86, %cst_48 {dimension_numbers = #tpu.dot_dimension_numbers<[1], [0], [0], [1], [0, 0, 1, 1], [], []>} : vector<32x16xbf16>, vector<16x16xbf16>, vector<32x16xf32> -> vector<32x16xf32>
    %98 = arith.addf %96, %97 : vector<32x16xf32>
    %cst_49 = arith.constant dense<0.000000e+00> : vector<32x16xf32>
    %99 = tpu.matmul %24, %90, %cst_49 {dimension_numbers = #tpu.dot_dimension_numbers<[1], [0], [0], [1], [0, 0, 1, 1], [], []>} : vector<32x16xbf16>, vector<16x16xbf16>, vector<32x16xf32> -> vector<32x16xf32>
    %cst_50 = arith.constant dense<0.000000e+00> : vector<32x16xf32>
    %100 = tpu.matmul %24, %93, %cst_50 {dimension_numbers = #tpu.dot_dimension_numbers<[1], [0], [0], [1], [0, 0, 1, 1], [], []>} : vector<32x16xbf16>, vector<16x16xbf16>, vector<32x16xf32> -> vector<32x16xf32>
    %101 = arith.addf %99, %100 : vector<32x16xf32>
    %cst_51 = arith.constant dense<0.000000e+00> : vector<32x16xf32>
    %102 = tpu.matmul %25, %90, %cst_51 {dimension_numbers = #tpu.dot_dimension_numbers<[1], [0], [0], [1], [0, 0, 1, 1], [], []>} : vector<32x16xbf16>, vector<16x16xbf16>, vector<32x16xf32> -> vector<32x16xf32>
    %103 = arith.addf %101, %102 : vector<32x16xf32>
    %104 = vector.extract_strided_slice %98 {offsets = [0, 0], sizes = [16, 16], strides = [1, 1]} : vector<32x16xf32> to vector<16x16xf32>
    %105 = vector.extract_strided_slice %103 {offsets = [16, 0], sizes = [16, 16], strides = [1, 1]} : vector<32x16xf32> to vector<16x16xf32>
    %106 = arith.subf %104, %105 : vector<16x16xf32>
    %107 = vector.extract_strided_slice %103 {offsets = [0, 0], sizes = [16, 16], strides = [1, 1]} : vector<32x16xf32> to vector<16x16xf32>
    %108 = vector.extract_strided_slice %98 {offsets = [16, 0], sizes = [16, 16], strides = [1, 1]} : vector<32x16xf32> to vector<16x16xf32>
    %109 = arith.addf %107, %108 : vector<16x16xf32>
    %110 = arith.mulf %106, %106 : vector<16x16xf32>
    %111 = arith.mulf %109, %109 : vector<16x16xf32>
    %112 = arith.addf %110, %111 : vector<16x16xf32>
    %113 = math.sqrt %112 : vector<16x16xf32>
    %114 = vector.shape_cast %113 : vector<16x16xf32> to vector<1x16x16xf32>
    %cst_52 = arith.constant dense<0xFF800000> : vector<1xf32>
    %115 = vector.multi_reduction <maximumf>, %114, %cst_52 [1, 2] : vector<1x16x16xf32> to vector<1xf32>
    %116 = vector.shape_cast %115 : vector<1xf32> to vector<1x1x1xf32>
    %117 = vector.extract %116[0, 0, 0] : f32 from vector<1x1x1xf32>
    %118 = vector.broadcast %117 : f32 to vector<1x1xf32>
    %cst_53 = arith.constant 0.000000e+00 : f32
    %119 = vector.broadcast %cst_53 : f32 to vector<1x1xf32>
    %120 = arith.cmpf ogt, %118, %119 : vector<1x1xf32>
    %121 = tpu.reciprocal %118 {approx = true} : vector<1x1xf32> -> vector<1x1xf32>
    %cst_54 = arith.constant 0.000000e+00 : f32
    %122 = vector.broadcast %cst_54 : f32 to vector<1x1xf32>
    %123 = arith.select %120, %121, %122 : vector<1x1xi1>, vector<1x1xf32>
    %124 = vector.broadcast %123 : vector<1x1xf32> to vector<16x16xf32>
    %125 = arith.mulf %113, %124 : vector<16x16xf32>
    %cst_55 = arith.constant 1.000000e+00 : f32
    %126 = vector.broadcast %cst_55 : f32 to vector<16x16xf32>
    %127 = arith.minimumf %125, %126 : vector<16x16xf32>
    %128 = arith.mulf %127, %112 : vector<16x16xf32>
    %129 = vector.shape_cast %128 : vector<16x16xf32> to vector<1x16x16xf32>
    %cst_56 = arith.constant dense<0.000000e+00> : vector<1xf32>
    %130 = vector.multi_reduction <add>, %129, %cst_56 [1, 2] : vector<1x16x16xf32> to vector<1xf32>
    %131 = vector.shape_cast %130 : vector<1xf32> to vector<1x1x1xf32>
    %132 = vector.extract %131[0, 0, 0] : f32 from vector<1x1x1xf32>
    %133 = arith.addf %79, %132 : f32
    %c2_i32 = arith.constant 2 : i32
    %c16_i32_57 = arith.constant 16 : i32
    %134 = arith.muli %c2_i32, %c16_i32_57 : i32
    %135 = tpu.assume_multiple %134, 8 : i32
    %136 = arith.index_cast %135 : i32 to index
    %c0_58 = arith.constant 0 : index
    %137 = vector.load %arg8[%136, %c0_58] : memref<64x16xf32, #tpu.memory_space<vmem>>, vector<16x16xf32>
    %138 = arith.index_cast %135 : i32 to index
    %c0_59 = arith.constant 0 : index
    %139 = vector.load %arg9[%138, %c0_59] : memref<64x16xf32, #tpu.memory_space<vmem>>, vector<16x16xf32>
    %140 = arith.truncf %137 : vector<16x16xf32> to vector<16x16xbf16>
    %141 = arith.extf %140 : vector<16x16xbf16> to vector<16x16xf32>
    %142 = arith.subf %137, %141 : vector<16x16xf32>
    %143 = arith.truncf %142 : vector<16x16xf32> to vector<16x16xbf16>
    %144 = arith.truncf %139 : vector<16x16xf32> to vector<16x16xbf16>
    %145 = arith.extf %144 : vector<16x16xbf16> to vector<16x16xf32>
    %146 = arith.subf %139, %145 : vector<16x16xf32>
    %147 = arith.truncf %146 : vector<16x16xf32> to vector<16x16xbf16>
    %cst_60 = arith.constant dense<0.000000e+00> : vector<32x16xf32>
    %148 = tpu.matmul %24, %140, %cst_60 {dimension_numbers = #tpu.dot_dimension_numbers<[1], [0], [0], [1], [0, 0, 1, 1], [], []>} : vector<32x16xbf16>, vector<16x16xbf16>, vector<32x16xf32> -> vector<32x16xf32>
    %cst_61 = arith.constant dense<0.000000e+00> : vector<32x16xf32>
    %149 = tpu.matmul %24, %143, %cst_61 {dimension_numbers = #tpu.dot_dimension_numbers<[1], [0], [0], [1], [0, 0, 1, 1], [], []>} : vector<32x16xbf16>, vector<16x16xbf16>, vector<32x16xf32> -> vector<32x16xf32>
    %150 = arith.addf %148, %149 : vector<32x16xf32>
    %cst_62 = arith.constant dense<0.000000e+00> : vector<32x16xf32>
    %151 = tpu.matmul %25, %140, %cst_62 {dimension_numbers = #tpu.dot_dimension_numbers<[1], [0], [0], [1], [0, 0, 1, 1], [], []>} : vector<32x16xbf16>, vector<16x16xbf16>, vector<32x16xf32> -> vector<32x16xf32>
    %152 = arith.addf %150, %151 : vector<32x16xf32>
    %cst_63 = arith.constant dense<0.000000e+00> : vector<32x16xf32>
    %153 = tpu.matmul %24, %144, %cst_63 {dimension_numbers = #tpu.dot_dimension_numbers<[1], [0], [0], [1], [0, 0, 1, 1], [], []>} : vector<32x16xbf16>, vector<16x16xbf16>, vector<32x16xf32> -> vector<32x16xf32>
    %cst_64 = arith.constant dense<0.000000e+00> : vector<32x16xf32>
    %154 = tpu.matmul %24, %147, %cst_64 {dimension_numbers = #tpu.dot_dimension_numbers<[1], [0], [0], [1], [0, 0, 1, 1], [], []>} : vector<32x16xbf16>, vector<16x16xbf16>, vector<32x16xf32> -> vector<32x16xf32>
    %155 = arith.addf %153, %154 : vector<32x16xf32>
    %cst_65 = arith.constant dense<0.000000e+00> : vector<32x16xf32>
    %156 = tpu.matmul %25, %144, %cst_65 {dimension_numbers = #tpu.dot_dimension_numbers<[1], [0], [0], [1], [0, 0, 1, 1], [], []>} : vector<32x16xbf16>, vector<16x16xbf16>, vector<32x16xf32> -> vector<32x16xf32>
    %157 = arith.addf %155, %156 : vector<32x16xf32>
    %158 = vector.extract_strided_slice %152 {offsets = [0, 0], sizes = [16, 16], strides = [1, 1]} : vector<32x16xf32> to vector<16x16xf32>
    %159 = vector.extract_strided_slice %157 {offsets = [16, 0], sizes = [16, 16], strides = [1, 1]} : vector<32x16xf32> to vector<16x16xf32>
    %160 = arith.subf %158, %159 : vector<16x16xf32>
    %161 = vector.extract_strided_slice %157 {offsets = [0, 0], sizes = [16, 16], strides = [1, 1]} : vector<32x16xf32> to vector<16x16xf32>
    %162 = vector.extract_strided_slice %152 {offsets = [16, 0], sizes = [16, 16], strides = [1, 1]} : vector<32x16xf32> to vector<16x16xf32>
    %163 = arith.addf %161, %162 : vector<16x16xf32>
    %164 = arith.mulf %160, %160 : vector<16x16xf32>
    %165 = arith.mulf %163, %163 : vector<16x16xf32>
    %166 = arith.addf %164, %165 : vector<16x16xf32>
    %167 = math.sqrt %166 : vector<16x16xf32>
    %168 = vector.shape_cast %167 : vector<16x16xf32> to vector<1x16x16xf32>
    %cst_66 = arith.constant dense<0xFF800000> : vector<1xf32>
    %169 = vector.multi_reduction <maximumf>, %168, %cst_66 [1, 2] : vector<1x16x16xf32> to vector<1xf32>
    %170 = vector.shape_cast %169 : vector<1xf32> to vector<1x1x1xf32>
    %171 = vector.extract %170[0, 0, 0] : f32 from vector<1x1x1xf32>
    %172 = vector.broadcast %171 : f32 to vector<1x1xf32>
    %cst_67 = arith.constant 0.000000e+00 : f32
    %173 = vector.broadcast %cst_67 : f32 to vector<1x1xf32>
    %174 = arith.cmpf ogt, %172, %173 : vector<1x1xf32>
    %175 = tpu.reciprocal %172 {approx = true} : vector<1x1xf32> -> vector<1x1xf32>
    %cst_68 = arith.constant 0.000000e+00 : f32
    %176 = vector.broadcast %cst_68 : f32 to vector<1x1xf32>
    %177 = arith.select %174, %175, %176 : vector<1x1xi1>, vector<1x1xf32>
    %178 = vector.broadcast %177 : vector<1x1xf32> to vector<16x16xf32>
    %179 = arith.mulf %167, %178 : vector<16x16xf32>
    %cst_69 = arith.constant 1.000000e+00 : f32
    %180 = vector.broadcast %cst_69 : f32 to vector<16x16xf32>
    %181 = arith.minimumf %179, %180 : vector<16x16xf32>
    %182 = arith.mulf %181, %166 : vector<16x16xf32>
    %183 = vector.shape_cast %182 : vector<16x16xf32> to vector<1x16x16xf32>
    %cst_70 = arith.constant dense<0.000000e+00> : vector<1xf32>
    %184 = vector.multi_reduction <add>, %183, %cst_70 [1, 2] : vector<1x16x16xf32> to vector<1xf32>
    %185 = vector.shape_cast %184 : vector<1xf32> to vector<1x1x1xf32>
    %186 = vector.extract %185[0, 0, 0] : f32 from vector<1x1x1xf32>
    %187 = arith.addf %133, %186 : f32
    %c3_i32 = arith.constant 3 : i32
    %c16_i32_71 = arith.constant 16 : i32
    %188 = arith.muli %c3_i32, %c16_i32_71 : i32
    %189 = tpu.assume_multiple %188, 8 : i32
    %190 = arith.index_cast %189 : i32 to index
    %c0_72 = arith.constant 0 : index
    %191 = vector.load %arg8[%190, %c0_72] : memref<64x16xf32, #tpu.memory_space<vmem>>, vector<16x16xf32>
    %192 = arith.index_cast %189 : i32 to index
    %c0_73 = arith.constant 0 : index
    %193 = vector.load %arg9[%192, %c0_73] : memref<64x16xf32, #tpu.memory_space<vmem>>, vector<16x16xf32>
    %194 = arith.truncf %191 : vector<16x16xf32> to vector<16x16xbf16>
    %195 = arith.extf %194 : vector<16x16xbf16> to vector<16x16xf32>
    %196 = arith.subf %191, %195 : vector<16x16xf32>
    %197 = arith.truncf %196 : vector<16x16xf32> to vector<16x16xbf16>
    %198 = arith.truncf %193 : vector<16x16xf32> to vector<16x16xbf16>
    %199 = arith.extf %198 : vector<16x16xbf16> to vector<16x16xf32>
    %200 = arith.subf %193, %199 : vector<16x16xf32>
    %201 = arith.truncf %200 : vector<16x16xf32> to vector<16x16xbf16>
    %cst_74 = arith.constant dense<0.000000e+00> : vector<32x16xf32>
    %202 = tpu.matmul %24, %194, %cst_74 {dimension_numbers = #tpu.dot_dimension_numbers<[1], [0], [0], [1], [0, 0, 1, 1], [], []>} : vector<32x16xbf16>, vector<16x16xbf16>, vector<32x16xf32> -> vector<32x16xf32>
    %cst_75 = arith.constant dense<0.000000e+00> : vector<32x16xf32>
    %203 = tpu.matmul %24, %197, %cst_75 {dimension_numbers = #tpu.dot_dimension_numbers<[1], [0], [0], [1], [0, 0, 1, 1], [], []>} : vector<32x16xbf16>, vector<16x16xbf16>, vector<32x16xf32> -> vector<32x16xf32>
    %204 = arith.addf %202, %203 : vector<32x16xf32>
    %cst_76 = arith.constant dense<0.000000e+00> : vector<32x16xf32>
    %205 = tpu.matmul %25, %194, %cst_76 {dimension_numbers = #tpu.dot_dimension_numbers<[1], [0], [0], [1], [0, 0, 1, 1], [], []>} : vector<32x16xbf16>, vector<16x16xbf16>, vector<32x16xf32> -> vector<32x16xf32>
    %206 = arith.addf %204, %205 : vector<32x16xf32>
    %cst_77 = arith.constant dense<0.000000e+00> : vector<32x16xf32>
    %207 = tpu.matmul %24, %198, %cst_77 {dimension_numbers = #tpu.dot_dimension_numbers<[1], [0], [0], [1], [0, 0, 1, 1], [], []>} : vector<32x16xbf16>, vector<16x16xbf16>, vector<32x16xf32> -> vector<32x16xf32>
    %cst_78 = arith.constant dense<0.000000e+00> : vector<32x16xf32>
    %208 = tpu.matmul %24, %201, %cst_78 {dimension_numbers = #tpu.dot_dimension_numbers<[1], [0], [0], [1], [0, 0, 1, 1], [], []>} : vector<32x16xbf16>, vector<16x16xbf16>, vector<32x16xf32> -> vector<32x16xf32>
    %209 = arith.addf %207, %208 : vector<32x16xf32>
    %cst_79 = arith.constant dense<0.000000e+00> : vector<32x16xf32>
    %210 = tpu.matmul %25, %198, %cst_79 {dimension_numbers = #tpu.dot_dimension_numbers<[1], [0], [0], [1], [0, 0, 1, 1], [], []>} : vector<32x16xbf16>, vector<16x16xbf16>, vector<32x16xf32> -> vector<32x16xf32>
    %211 = arith.addf %209, %210 : vector<32x16xf32>
    %212 = vector.extract_strided_slice %206 {offsets = [0, 0], sizes = [16, 16], strides = [1, 1]} : vector<32x16xf32> to vector<16x16xf32>
    %213 = vector.extract_strided_slice %211 {offsets = [16, 0], sizes = [16, 16], strides = [1, 1]} : vector<32x16xf32> to vector<16x16xf32>
    %214 = arith.subf %212, %213 : vector<16x16xf32>
    %215 = vector.extract_strided_slice %211 {offsets = [0, 0], sizes = [16, 16], strides = [1, 1]} : vector<32x16xf32> to vector<16x16xf32>
    %216 = vector.extract_strided_slice %206 {offsets = [16, 0], sizes = [16, 16], strides = [1, 1]} : vector<32x16xf32> to vector<16x16xf32>
    %217 = arith.addf %215, %216 : vector<16x16xf32>
    %218 = arith.mulf %214, %214 : vector<16x16xf32>
    %219 = arith.mulf %217, %217 : vector<16x16xf32>
    %220 = arith.addf %218, %219 : vector<16x16xf32>
    %221 = math.sqrt %220 : vector<16x16xf32>
    %222 = vector.shape_cast %221 : vector<16x16xf32> to vector<1x16x16xf32>
    %cst_80 = arith.constant dense<0xFF800000> : vector<1xf32>
    %223 = vector.multi_reduction <maximumf>, %222, %cst_80 [1, 2] : vector<1x16x16xf32> to vector<1xf32>
    %224 = vector.shape_cast %223 : vector<1xf32> to vector<1x1x1xf32>
    %225 = vector.extract %224[0, 0, 0] : f32 from vector<1x1x1xf32>
    %226 = vector.broadcast %225 : f32 to vector<1x1xf32>
    %cst_81 = arith.constant 0.000000e+00 : f32
    %227 = vector.broadcast %cst_81 : f32 to vector<1x1xf32>
    %228 = arith.cmpf ogt, %226, %227 : vector<1x1xf32>
    %229 = tpu.reciprocal %226 {approx = true} : vector<1x1xf32> -> vector<1x1xf32>
    %cst_82 = arith.constant 0.000000e+00 : f32
    %230 = vector.broadcast %cst_82 : f32 to vector<1x1xf32>
    %231 = arith.select %228, %229, %230 : vector<1x1xi1>, vector<1x1xf32>
    %232 = vector.broadcast %231 : vector<1x1xf32> to vector<16x16xf32>
    %233 = arith.mulf %221, %232 : vector<16x16xf32>
    %cst_83 = arith.constant 1.000000e+00 : f32
    %234 = vector.broadcast %cst_83 : f32 to vector<16x16xf32>
    %235 = arith.minimumf %233, %234 : vector<16x16xf32>
    %236 = arith.mulf %235, %220 : vector<16x16xf32>
    %237 = vector.shape_cast %236 : vector<16x16xf32> to vector<1x16x16xf32>
    %cst_84 = arith.constant dense<0.000000e+00> : vector<1xf32>
    %238 = vector.multi_reduction <add>, %237, %cst_84 [1, 2] : vector<1x16x16xf32> to vector<1xf32>
    %239 = vector.shape_cast %238 : vector<1xf32> to vector<1x1x1xf32>
    %240 = vector.extract %239[0, 0, 0] : f32 from vector<1x1x1xf32>
    %241 = arith.addf %187, %240 : f32
    %c4_i32 = arith.constant 4 : i32
    %242 = vector.broadcast %241 : f32 to vector<1x8x128xf32>
    %c0_85 = arith.constant 0 : index
    %c0_86 = arith.constant 0 : index
    %c0_87 = arith.constant 0 : index
    %243 = vector.load %arg7[%c0_85, %c0_86, %c0_87] : memref<1x8x128xf32, #tpu.memory_space<vmem>>, vector<1x8x128xf32>
    tpu.vector_store %arg7[%c0_85, %c0_86, %c0_87], %242 {strides = array<i32>} : memref<1x8x128xf32, #tpu.memory_space<vmem>>, vector<1x8x128xf32>,
    return
  }
  func.func @transform_0(%arg0: i32) -> (i32, i32) {
    %c0_i32 = arith.constant 0 : i32
    %c0_i32_0 = arith.constant 0 : i32
    %c0_i32_1 = arith.constant 0 : i32
    return %c0_i32, %c0_i32_0 : i32, i32
  }
  func.func @transform_1(%arg0: i32) -> (i32, i32) {
    %c0_i32 = arith.constant 0 : i32
    %c0_i32_0 = arith.constant 0 : i32
    %c0_i32_1 = arith.constant 0 : i32
    return %c0_i32, %c0_i32_0 : i32, i32
  }
  func.func @transform_2(%arg0: i32) -> (i32, i32, i32) {
    %c0_i32 = arith.constant 0 : i32
    %c0_i32_0 = arith.constant 0 : i32
    %c0_i32_1 = arith.constant 0 : i32
    %c0_i32_2 = arith.constant 0 : i32
    return %c0_i32, %c0_i32_0, %c0_i32_1 : i32, i32, i32
  }
  func.func @transform_3(%arg0: i32) -> (i32, i32, i32) {
    %c0_i32 = arith.constant 0 : i32
    %c0_i32_0 = arith.constant 0 : i32
    %c0_i32_1 = arith.constant 0 : i32
    %c0_i32_2 = arith.constant 0 : i32
    return %c0_i32, %c0_i32_0, %c0_i32_1 : i32, i32, i32
  }
  func.func @transform_4(%arg0: i32) -> (i32, i32, i32) {
    %c0_i32 = arith.constant 0 : i32
    %c0_i32_0 = arith.constant 0 : i32
    %c0_i32_1 = arith.constant 0 : i32
    return %arg0, %c0_i32, %c0_i32_0 : i32, i32, i32
  }
  func.func @transform_5(%arg0: i32) -> (i32, i32, i32) {
    %c0_i32 = arith.constant 0 : i32
    %c0_i32_0 = arith.constant 0 : i32
    %c0_i32_1 = arith.constant 0 : i32
    return %arg0, %c0_i32, %c0_i32_0 : i32, i32, i32
  }
  func.func @transform_6(%arg0: i32) -> (i32, i32, i32) {
    %c0_i32 = arith.constant 0 : i32
    %c0_i32_0 = arith.constant 0 : i32
    %c0_i32_1 = arith.constant 0 : i32
    return %arg0, %c0_i32, %c0_i32_0 : i32, i32, i32
  }
}

</mosaic_0001>

<bundles_post_ra>
// kernel: tpu_custom_call.1
= control target key start
LH: loop header
LB: loop body
LE: loop exit
PB: predicated region body
PF: predicated region fallthrough
CT: control target
= control target key end

     0   :  { %11 = vsyncpa [#allocation5], 0  ;;  %s3162_s0 = inlined_call_operand.vmem [shape: bf16[32,16], index: 0, kind: input, shape index: {}]   ;;  %s3163_s1 = inlined_call_operand.vmem [shape: bf16[32,16], index: 1, kind: input, shape index: {}]   ;;  %s3164_s2 = inlined_call_operand.hbm [shape: bf16[2,16,16], index: 2, kind: input, shape index: {}]   ;;  %s3165_s3 = inlined_call_operand.hbm [shape: bf16[2,16,16], index: 3, kind: input, shape index: {}]   ;;  %s3166_s4 = inlined_call_operand.vmem [shape: bf16[4,16,16], index: 4, kind: input, shape index: {}]   ;;  %s3167_s5 = inlined_call_operand.vmem [shape: bf16[4,16,16], index: 5, kind: input, shape index: {}]   ;;  %s3168_s6 = inlined_call_operand.hbm [shape: f32[1,8,128], index: 6, kind: output, shape index: {}]  }
   0x1   :  { %12 = vsyncpa [#allocation8], 0 }
   0x2   :  { %13 = vsyncpa [#allocation6], 0  ;;  %s2785_s21 = smov [#allocation4]   ;;  %s2713_s25 = scalar_lea.hbm %s3164_s2, 256 }
   0x3   :  { %s23_s22 = sshll.u32 %s2785_s21, 4  ;;  %p2714_p0 = scmp.ne.s32.totalorder %s3164_s2, %s2713_s25  ;;  %s24_s22 = int_to_ptr.vmem [resolvable:$true] %s23_s22 }
   0x4   :  { %p2717_p1 = scmp.lt.u32.totalorder %s2713_s25, %s3164_s2 }
   0x6   :  { %p2719_p2 = pnand %p2717_p1, %p2714_p0 }
   0x8   :  { %2722 = shalt.err (!%p2719_p2)
}
   0x9   :  { %s2723_s30 = scalar_lea.vmem %s24_s22, 256  ;;  %p2728_p4 = scmp.lt.s32.totalorder %s24_s22, %s24_s22 }
   0xa   :  { %p2724_p3 = scmp.ne.s32.totalorder %s24_s22, %s2723_s30  ;;  %p2729_p5 = scmp.lt.s32.totalorder %s2723_s30, %s2723_s30 }
   0xc   :  { %p2730_p6 = por %p2729_p5, %p2728_p4 }
   0xe   :  { %p2731_p7 = pnand %p2730_p6, %p2724_p3 }
  0x10   :  { %2734 = shalt.err (!%p2731_p7)
}
  0x11   :  { %s2786_s7 = smov 64   ;;  %s2787_s8 = smov 4  }
  0x12   :  { %29 = dma.hbm_to_vmem [thread:$0]  %s3164_s2, 256, %s24_s22, [#allocation5], %s2786_s7, %s2786_s7, %s2787_s8  }
  0x13   :  { %s2788_s11 = smov [#allocation7]   ;;  %s2735_s15 = scalar_lea.hbm %s3165_s3, 256 }
  0x14   :  { %s35_s12 = sshll.u32 %s2788_s11, 4  ;;  %p2736_p8 = scmp.ne.s32.totalorder %s3165_s3, %s2735_s15  ;;  %s36_s12 = int_to_ptr.vmem [resolvable:$true] %s35_s12 }
  0x15   :  { %p2739_p9 = scmp.lt.u32.totalorder %s2735_s15, %s3165_s3 }
  0x17   :  { %p2741_p10 = pnand %p2739_p9, %p2736_p8 }
  0x19   :  { %2744 = shalt.err (!%p2741_p10)
}
  0x1a   :  { %s2745_s20 = scalar_lea.vmem %s36_s12, 256  ;;  %p2750_p12 = scmp.lt.s32.totalorder %s36_s12, %s36_s12 }
  0x1b   :  { %p2746_p11 = scmp.ne.s32.totalorder %s36_s12, %s2745_s20  ;;  %p2751_p13 = scmp.lt.s32.totalorder %s2745_s20, %s2745_s20 }
  0x1d   :  { %p2752_p0 = por %p2751_p13, %p2750_p12 }
  0x1f   :  { %p2753_p1 = pnand %p2752_p0, %p2746_p11 }
  0x21   :  { %2756 = shalt.err (!%p2753_p1)
}
  0x22   :  { %41 = dma.hbm_to_vmem [thread:$0]  %s3165_s3, 256, %s36_s12, [#allocation8], %s2786_s7, %s2786_s7, %s2787_s8  }
  0x23   :  { %2779 = dma.done.wait [#allocation5], 256  }
  0x24   :  { %2780 = vsyncadd [#allocation5], 4294967040 }
  0x25   :  { %2781 = dma.done.wait [#allocation8], 256  }
  0x26   :  { %2782 = vsyncadd [#allocation8], 4294967040  ;;  %v2673_v0 = vld [vmem:[#allocation7] sm:$0xff]   ;;  %v2674_v1 = vld [vmem:[#allocation7 + $0x8] sm:$0xff]   ;;  %vm105_vm0 = vcmask 130048   ;;  %s2789_s25 = smov [#allocation9]  }
  0x27   :  { %2352 = vmatprep.subr.bf16.mxu0 %v2673_v0  ;;  %v2675_v2 = vld [vmem:[%s3166_s4] sm:$0xff]   ;;  %2382 = vmatprep.subr.bf16.mxu1 %v2674_v1  ;;  %v2676_v3 = vld [vmem:[%s3166_s4 + $0x8] sm:$0xff]   ;;  %v2677_v4 = vld [vmem:[%s3166_s4 + $0x10] sm:$0xff]   ;;  %s2152_s3 = sshll.u32 %s2789_s25, 4  ;;  %s2153_s3 = int_to_ptr.vmem [resolvable:$true] %s2152_s3 }
  0x28   :  { %2353 = vmatpush3.bf16.msra.mxu0 %v2673_v0  ;;  %2383 = vmatpush3.bf16.msra.mxu1 %v2674_v1  ;;  %v2679_v5 = vld [vmem:[#allocation4] sm:$0xff]   ;;  %v2680_v6 = vld [vmem:[#allocation4 + $0x8] sm:$0xff]   ;;  %v2681_v8 = vld [vmem:[%s3167_s5] sm:$0xff]   ;;  %s2757_s28 = scalar_lea.vmem %s2153_s3, 128  ;;  %p2762_p3 = scmp.lt.s32.totalorder %s2153_s3, %s2153_s3 }
  0x29   :  { %2354 = vmatprep.mubr.msk.bf16.mxu0 %vm105_vm0, %v2675_v2  ;;  %2384 = vmatprep.mubr.msk.bf16.mxu1 %vm105_vm0, %v2675_v2  ;;  %v2678_v7 = vld [vmem:[%s3166_s4 + $0x18] sm:$0xff]   ;;  %v2682_v9 = vld [vmem:[%s3167_s5 + $0x8] sm:$0xff]   ;;  %v2683_v10 = vld [vmem:[%s3167_s5 + $0x10] sm:$0xff]   ;;  %p2758_p2 = scmp.ne.s32.totalorder %s2153_s3, %s2757_s28  ;;  %p2763_p4 = scmp.lt.s32.totalorder %s2757_s28, %s2757_s28 }
  0x2a   :  { %2362 = vmatprep.subr.bf16.mxu0 %v2679_v5  ;;  %2392 = vmatprep.subr.bf16.mxu1 %v2680_v6  ;;  %v2684_v11 = vld [vmem:[%s3167_s5 + $0x18] sm:$0xff]   ;;  %v2900_v12 = vld [vmem:[%s3162_s0] sm:$0xff]   ;;  %v2925_v45 = vld [vmem:[%s3162_s0 + $0x8] sm:$0xff]  }
  0x2b   :  { %2355 = vmatmul.mubr.msk.bf16.vlgmr.msra.gmra.mrb[0].mxu0 %vm105_vm0, %v2676_v3  ;;  %2385 = vmatmul.mubr.msk.bf16.vlgmr.msra.gmra.mrb[0].mxu1 %vm105_vm0, %v2676_v3  ;;  %v2938_v60 = vld [vmem:[%s3163_s1] sm:$0xff]   ;;  %v2951_v63 = vld [vmem:[%s3163_s1 + $0x8] sm:$0xff]   ;;  %p2764_p5 = por %p2763_p4, %p2762_p3 }
  0x2c   :  { %2358 = vmatprep.mubr.msk.bf16.mxu0 %vm105_vm0, %v2677_v4  ;;  %2388 = vmatprep.mubr.msk.bf16.mxu1 %vm105_vm0, %v2677_v4 }
  0x2d   :  { %2363 = vmatpush3.bf16.msra.mxu0 %v2679_v5  ;;  %2393 = vmatpush3.bf16.msra.mxu1 %v2680_v6  ;;  %p2765_p6 = pnand %p2764_p5, %p2758_p2 }
  0x2e   :  { %2372 = vmatprep.subr.bf16.mxu0 %v2679_v5  ;;  %2402 = vmatprep.subr.bf16.mxu1 %v2680_v6 }
  0x33   :  { %2359 = vmatmul.mubr.msk.bf16.gmra.mrb[4].mxu0 %vm105_vm0, %v2678_v7  ;;  %2389 = vmatmul.mubr.msk.bf16.gmra.mrb[4].mxu1 %vm105_vm0, %v2678_v7 }
  0x34   :  { %2364 = vmatprep.mubr.msk.bf16.mxu0 %vm105_vm0, %v2675_v2  ;;  %2394 = vmatprep.mubr.msk.bf16.mxu1 %vm105_vm0, %v2675_v2 }
  0x3b   :  { %2365 = vmatmul.mubr.msk.bf16.vlgmr.msra.gmra.mrb[0].mxu0 %vm105_vm0, %v2676_v3  ;;  %2395 = vmatmul.mubr.msk.bf16.vlgmr.msra.gmra.mrb[0].mxu1 %vm105_vm0, %v2676_v3 }
  0x3c   :  { %2368 = vmatprep.mubr.msk.bf16.mxu0 %vm105_vm0, %v2677_v4  ;;  %2398 = vmatprep.mubr.msk.bf16.mxu1 %vm105_vm0, %v2677_v4 }
  0x3d   :  { %2373 = vmatpush3.bf16.msra.mxu0 %v2679_v5  ;;  %2403 = vmatpush3.bf16.msra.mxu1 %v2680_v6 }
  0x43   :  { %2369 = vmatmul.mubr.msk.bf16.gmra.mrb[4].mxu0 %vm105_vm0, %v2678_v7  ;;  %2399 = vmatmul.mubr.msk.bf16.gmra.mrb[4].mxu1 %vm105_vm0, %v2678_v7 }
  0x44   :  { %2374 = vmatprep.mubr.msk.bf16.mxu0 %vm105_vm0, %v2681_v8  ;;  %2404 = vmatprep.mubr.msk.bf16.mxu1 %vm105_vm0, %v2681_v8 }
  0x4b   :  { %2375 = vmatmul.mubr.msk.bf16.vlgmr.msra.gmra.mrb[0].mxu0 %vm105_vm0, %v2682_v9  ;;  %2405 = vmatmul.mubr.msk.bf16.vlgmr.msra.gmra.mrb[0].mxu1 %vm105_vm0, %v2682_v9 }
  0x4c   :  { %2378 = vmatprep.mubr.msk.bf16.mxu0 %vm105_vm0, %v2683_v10  ;;  %2408 = vmatprep.mubr.msk.bf16.mxu1 %vm105_vm0, %v2683_v10 }
  0x53   :  { %2379 = vmatmul.mubr.msk.bf16.gmra.mrb[4].mxu0 %vm105_vm0, %v2684_v11  ;;  %2409 = vmatmul.mubr.msk.bf16.gmra.mrb[4].mxu1 %vm105_vm0, %v2684_v11 }
  0x54   :  { %2414 = vmatprep.mubr.msk.bf16.mxu0 %vm105_vm0, %v2900_v12  ;;  %2432 = vmatprep.mubr.msk.bf16.mxu1 %vm105_vm0, %v2900_v12 }
 0x11e   :  { %v2376_v13 = vpop.f32.mrb[0].mxu0  ;;  %v2406_v14 = vpop.f32.mrb[0].mxu1 }
 0x11f   :  { %361 = vst.msk [vmem:[#allocation2 + $0x10] sm:$0xff] %vm105_vm0, %v2376_v13  ;;  %v320_v15 = vpop.f32.mrb[1].mxu0  ;;  %584 = vst.msk [vmem:[#allocation3 + $0x10] sm:$0xff] %vm105_vm0, %v2406_v14  ;;  %v543_v16 = vpop.f32.mrb[1].mxu1 }
 0x120   :  { %359 = vst.msk [vmem:[#allocation2] sm:$0xff] %vm105_vm0, %v320_v15  ;;  %v2377_v17 = vpop.f32.mrb[2].mxu0  ;;  %582 = vst.msk [vmem:[#allocation3] sm:$0xff] %vm105_vm0, %v543_v16  ;;  %v2407_v18 = vpop.f32.mrb[2].mxu1 }
 0x121   :  { %362 = vst.msk [vmem:[#allocation2 + $0x18] sm:$0xff] %vm105_vm0, %v2377_v17  ;;  %v323_v19 = vpop.f32.mrb[3].mxu0  ;;  %585 = vst.msk [vmem:[#allocation3 + $0x18] sm:$0xff] %vm105_vm0, %v2407_v18  ;;  %v546_v20 = vpop.f32.mrb[3].mxu1 }
 0x122   :  { %360 = vst.msk [vmem:[#allocation2 + $0x8] sm:$0xff] %vm105_vm0, %v323_v19  ;;  %583 = vst.msk [vmem:[#allocation3 + $0x8] sm:$0xff] %vm105_vm0, %v546_v20 }
 0x126   :  { %v2380_v21 = vpop.f32.mrb[4].mxu0  ;;  %v2410_v22 = vpop.f32.mrb[4].mxu1  ;;  %v1008_v48 = vld [vmem:[#allocation2 + $0x10] sm:$0xff] }
 0x127   :  { %365 = vst.msk [vmem:[#allocation2 + $0x30] sm:$0xff] %vm105_vm0, %v2380_v21  ;;  %v336_v23 = vpop.f32.mrb[5].mxu0  ;;  %588 = vst.msk [vmem:[#allocation3 + $0x30] sm:$0xff] %vm105_vm0, %v2410_v22  ;;  %v559_v24 = vpop.f32.mrb[5].mxu1  ;;  %v598_v28 = vld [vmem:[#allocation2] sm:$0xff]  ;;  %v1011_v50 = vld [vmem:[#allocation3 + $0x10] sm:$0xff] }
 0x128   :  { %363 = vst.msk [vmem:[#allocation2 + $0x20] sm:$0xff] %vm105_vm0, %v336_v23  ;;  %v2381_v25 = vpop.f32.mrb[6].mxu0  ;;  %586 = vst.msk [vmem:[#allocation3 + $0x20] sm:$0xff] %vm105_vm0, %v559_v24  ;;  %v2411_v26 = vpop.f32.mrb[6].mxu1  ;;  %v600_v32 = vld [vmem:[#allocation3] sm:$0xff]  ;;  %v1009_v46 = vld [vmem:[#allocation2 + $0x18] sm:$0xff] }
 0x129   :  { %366 = vst.msk [vmem:[#allocation2 + $0x38] sm:$0xff] %vm105_vm0, %v2381_v25  ;;  %v339_v27 = vpop.f32.mrb[7].mxu0  ;;  %v599_v29 = vld [vmem:[#allocation2 + $0x8] sm:$0xff]  ;;  %589 = vst.msk [vmem:[#allocation3 + $0x38] sm:$0xff] %vm105_vm0, %v2411_v26  ;;  %v562_v30 = vpop.f32.mrb[7].mxu1  ;;  %v1012_v47 = vld [vmem:[#allocation3 + $0x18] sm:$0xff]  ;;  %v1013_v49 = vpack.c.bf16 %v1009_v46, %v1008_v48 }
 0x12a   :  { %364 = vst.msk [vmem:[#allocation2 + $0x28] sm:$0xff] %vm105_vm0, %v339_v27  ;;  %v602_v31 = vpack.c.bf16 %v599_v29, %v598_v28  ;;  %v601_v33 = vld [vmem:[#allocation3 + $0x8] sm:$0xff]  ;;  %587 = vst.msk [vmem:[#allocation3 + $0x28] sm:$0xff] %vm105_vm0, %v562_v30  ;;  %v1019_v51 = vpack.c.bf16 %v1012_v47, %v1011_v50 }
 0x12b   :  { %v608_v34 = vpack.c.bf16 %v601_v33, %v600_v32  ;;  %v1014_v52 = vunpack.c.l.bf16 %v1013_v49  ;;  %v1015_v53 = vunpack.c.h.bf16 %v1013_v49 }
 0x12c   :  { %v603_v35 = vunpack.c.l.bf16 %v602_v31  ;;  %v604_v36 = vunpack.c.h.bf16 %v602_v31  ;;  %v1020_v54 = vunpack.c.l.bf16 %v1019_v51  ;;  %v1021_v55 = vunpack.c.h.bf16 %v1019_v51 }
 0x12d   :  { %v609_v37 = vunpack.c.l.bf16 %v608_v34  ;;  %v610_v38 = vunpack.c.h.bf16 %v608_v34  ;;  %v1016_v56 = vsub.f32 %v1008_v48, %v1014_v52  ;;  %v1017_v57 = vsub.f32 %v1009_v46, %v1015_v53 }
 0x12e   :  { %v605_v39 = vsub.f32 %v598_v28, %v603_v35  ;;  %v606_v40 = vsub.f32 %v599_v29, %v604_v36  ;;  %v1022_v58 = vsub.f32 %v1011_v50, %v1020_v54  ;;  %v1023_v59 = vsub.f32 %v1012_v47, %v1021_v55  ;;  %v1766_v19 = vld [vmem:[#allocation2 + $0x30] sm:$0xff] }
 0x12f   :  { %v611_v41 = vsub.f32 %v600_v32, %v609_v37  ;;  %v612_v42 = vsub.f32 %v601_v33, %v610_v38  ;;  %v1018_v61 = vpack.c.bf16 %v1017_v57, %v1016_v56  ;;  %v1387_v2 = vld [vmem:[#allocation2 + $0x20] sm:$0xff]  ;;  %v1769_v21 = vld [vmem:[#allocation3 + $0x30] sm:$0xff] }
 0x130   :  { %v607_v43 = vpack.c.bf16 %v606_v40, %v605_v39  ;;  %v1024_v62 = vpack.c.bf16 %v1023_v59, %v1022_v58  ;;  %v1390_v4 = vld [vmem:[#allocation3 + $0x20] sm:$0xff]  ;;  %v1767_v17 = vld [vmem:[#allocation2 + $0x38] sm:$0xff] }
 0x131   :  { %v613_v44 = vpack.c.bf16 %v612_v42, %v611_v41  ;;  %v1388_v0 = vld [vmem:[#allocation2 + $0x28] sm:$0xff]  ;;  %v1770_v18 = vld [vmem:[#allocation3 + $0x38] sm:$0xff]  ;;  %v1771_v20 = vpack.c.bf16 %v1767_v17, %v1766_v19 }
 0x132   :  { %2412 = vmatprep.subr.bf16.mxu0 %v607_v43  ;;  %v1391_v1 = vld [vmem:[#allocation3 + $0x28] sm:$0xff]  ;;  %v1392_v3 = vpack.c.bf16 %v1388_v0, %v1387_v2  ;;  %v1777_v22 = vpack.c.bf16 %v1770_v18, %v1769_v21 }
 0x133   :  { %2430 = vmatprep.subr.bf16.mxu1 %v613_v44  ;;  %2413 = vmatpush3.bf16.msra.mxu0 %v607_v43  ;;  %v1398_v5 = vpack.c.bf16 %v1391_v1, %v1390_v4  ;;  %v1772_v23 = vunpack.c.l.bf16 %v1771_v20  ;;  %v1773_v24 = vunpack.c.h.bf16 %v1771_v20 }
 0x134   :  { %2431 = vmatpush3.bf16.msra.mxu1 %v613_v44  ;;  %2418 = vmatprep.subr.bf16.mxu0 %v602_v31  ;;  %v1393_v6 = vunpack.c.l.bf16 %v1392_v3  ;;  %v1394_v7 = vunpack.c.h.bf16 %v1392_v3  ;;  %v1778_v25 = vunpack.c.l.bf16 %v1777_v22  ;;  %v1779_v26 = vunpack.c.h.bf16 %v1777_v22 }
 0x135   :  { %2436 = vmatprep.subr.bf16.mxu1 %v608_v34  ;;  %v1399_v8 = vunpack.c.l.bf16 %v1398_v5  ;;  %v1400_v9 = vunpack.c.h.bf16 %v1398_v5  ;;  %v1774_v27 = vsub.f32 %v1766_v19, %v1772_v23  ;;  %v1775_v28 = vsub.f32 %v1767_v17, %v1773_v24 }
 0x136   :  { %2415 = vmatmul.mubr.msk.bf16.vlgmr.msra.gmra.mrb[8].mxu0 %vm105_vm0, %v2925_v45  ;;  %v1395_v10 = vsub.f32 %v1387_v2, %v1393_v6  ;;  %v1396_v11 = vsub.f32 %v1388_v0, %v1394_v7  ;;  %v1780_v29 = vsub.f32 %v1769_v21, %v1778_v25  ;;  %v1781_v30 = vsub.f32 %v1770_v18, %v1779_v26 }
 0x137   :  { %2433 = vmatmul.mubr.msk.bf16.vlgmr.msra.gmra.mrb[8].mxu1 %vm105_vm0, %v2925_v45  ;;  %2419 = vmatpush3.bf16.msra.mxu0 %v602_v31  ;;  %v1401_v13 = vsub.f32 %v1390_v4, %v1399_v8  ;;  %v1402_v14 = vsub.f32 %v1391_v1, %v1400_v9 }
 0x138   :  { %2437 = vmatpush3.bf16.msra.mxu1 %v608_v34  ;;  %2424 = vmatprep.subr.bf16.mxu0 %v602_v31  ;;  %v1397_v15 = vpack.c.bf16 %v1396_v11, %v1395_v10  ;;  %v1782_v32 = vpack.c.bf16 %v1781_v30, %v1780_v29 }
 0x139   :  { %2442 = vmatprep.subr.bf16.mxu1 %v608_v34  ;;  %2420 = vmatprep.mubr.msk.bf16.mxu0 %vm105_vm0, %v2900_v12  ;;  %v1403_v16 = vpack.c.bf16 %v1402_v14, %v1401_v13 }
 0x13a   :  { %2438 = vmatprep.mubr.msk.bf16.mxu1 %vm105_vm0, %v2900_v12 }
 0x142   :  { %2421 = vmatmul.mubr.msk.bf16.vlgmr.msra.gmra.mrb[8].mxu0 %vm105_vm0, %v2925_v45 }
 0x143   :  { %2425 = vmatpush3.bf16.msra.mxu0 %v602_v31  ;;  %2439 = vmatmul.mubr.msk.bf16.vlgmr.msra.gmra.mrb[8].mxu1 %vm105_vm0, %v2925_v45  ;;  %v1776_v31 = vpack.c.bf16 %v1775_v28, %v1774_v27 }
 0x144   :  { %2443 = vmatpush3.bf16.msra.mxu1 %v608_v34  ;;  %2448 = vmatprep.subr.bf16.mxu0 %v1018_v61 }
 0x145   :  { %2466 = vmatprep.subr.bf16.mxu1 %v1024_v62  ;;  %2426 = vmatprep.mubr.msk.bf16.mxu0 %vm105_vm0, %v2938_v60 }
 0x146   :  { %2444 = vmatprep.mubr.msk.bf16.mxu1 %vm105_vm0, %v2938_v60 }
 0x14e   :  { %2427 = vmatmul.mubr.msk.bf16.vlgmr.msra.gmra.mrb[8].mxu0 %vm105_vm0, %v2951_v63 }
 0x14f   :  { %2445 = vmatmul.mubr.msk.bf16.vlgmr.msra.gmra.mrb[8].mxu1 %vm105_vm0, %v2951_v63  ;;  %2449 = vmatpush3.bf16.msra.mxu0 %v1018_v61 }
 0x150   :  { %2467 = vmatpush3.bf16.msra.mxu1 %v1024_v62  ;;  %2454 = vmatprep.subr.bf16.mxu0 %v1013_v49 }
 0x151   :  { %2472 = vmatprep.subr.bf16.mxu1 %v1019_v51  ;;  %2450 = vmatprep.mubr.msk.bf16.mxu0 %vm105_vm0, %v2900_v12 }
 0x152   :  { %2468 = vmatprep.mubr.msk.bf16.mxu1 %vm105_vm0, %v2900_v12 }
 0x156   :  { %2451 = vmatmul.mubr.msk.bf16.vlgmr.msra.gmra.mrb[12].mxu0 %vm105_vm0, %v2925_v45 }
 0x157   :  { %2455 = vmatpush3.bf16.msra.mxu0 %v1013_v49  ;;  %2469 = vmatmul.mubr.msk.bf16.vlgmr.msra.gmra.mrb[12].mxu1 %vm105_vm0, %v2925_v45 }
 0x158   :  { %2473 = vmatpush3.bf16.msra.mxu1 %v1019_v51  ;;  %2460 = vmatprep.subr.bf16.mxu0 %v1013_v49 }
 0x159   :  { %2478 = vmatprep.subr.bf16.mxu1 %v1019_v51  ;;  %2456 = vmatprep.mubr.msk.bf16.mxu0 %vm105_vm0, %v2900_v12 }
 0x15a   :  { %2474 = vmatprep.mubr.msk.bf16.mxu1 %vm105_vm0, %v2900_v12 }
 0x162   :  { %2457 = vmatmul.mubr.msk.bf16.vlgmr.msra.gmra.mrb[12].mxu0 %vm105_vm0, %v2925_v45 }
 0x163   :  { %2461 = vmatpush3.bf16.msra.mxu0 %v1013_v49  ;;  %2475 = vmatmul.mubr.msk.bf16.vlgmr.msra.gmra.mrb[12].mxu1 %vm105_vm0, %v2925_v45 }
 0x164   :  { %2479 = vmatpush3.bf16.msra.mxu1 %v1019_v51  ;;  %2484 = vmatprep.subr.bf16.mxu0 %v1397_v15 }
 0x165   :  { %2502 = vmatprep.subr.bf16.mxu1 %v1403_v16  ;;  %2462 = vmatprep.mubr.msk.bf16.mxu0 %vm105_vm0, %v2938_v60 }
 0x166   :  { %2480 = vmatprep.mubr.msk.bf16.mxu1 %vm105_vm0, %v2938_v60 }
 0x16e   :  { %2463 = vmatmul.mubr.msk.bf16.vlgmr.msra.gmra.mrb[12].mxu0 %vm105_vm0, %v2951_v63 }
 0x16f   :  { %2481 = vmatmul.mubr.msk.bf16.vlgmr.msra.gmra.mrb[12].mxu1 %vm105_vm0, %v2951_v63  ;;  %2485 = vmatpush3.bf16.msra.mxu0 %v1397_v15 }
 0x170   :  { %2503 = vmatpush3.bf16.msra.mxu1 %v1403_v16  ;;  %2490 = vmatprep.subr.bf16.mxu0 %v1392_v3 }
 0x171   :  { %2508 = vmatprep.subr.bf16.mxu1 %v1398_v5  ;;  %2486 = vmatprep.mubr.msk.bf16.mxu0 %vm105_vm0, %v2900_v12 }
 0x172   :  { %2504 = vmatprep.mubr.msk.bf16.mxu1 %vm105_vm0, %v2900_v12 }
 0x176   :  { %2487 = vmatmul.mubr.msk.bf16.vlgmr.msra.gmra.mrb[16].mxu0 %vm105_vm0, %v2925_v45 }
 0x177   :  { %2491 = vmatpush3.bf16.msra.mxu0 %v1392_v3  ;;  %2505 = vmatmul.mubr.msk.bf16.vlgmr.msra.gmra.mrb[16].mxu1 %vm105_vm0, %v2925_v45 }
 0x178   :  { %2509 = vmatpush3.bf16.msra.mxu1 %v1398_v5  ;;  %2496 = vmatprep.subr.bf16.mxu0 %v1392_v3 }
 0x179   :  { %2514 = vmatprep.subr.bf16.mxu1 %v1398_v5  ;;  %2492 = vmatprep.mubr.msk.bf16.mxu0 %vm105_vm0, %v2900_v12 }
 0x17a   :  { %2510 = vmatprep.mubr.msk.bf16.mxu1 %vm105_vm0, %v2900_v12 }
 0x182   :  { %2493 = vmatmul.mubr.msk.bf16.vlgmr.msra.gmra.mrb[16].mxu0 %vm105_vm0, %v2925_v45 }
 0x183   :  { %2497 = vmatpush3.bf16.msra.mxu0 %v1392_v3  ;;  %2511 = vmatmul.mubr.msk.bf16.vlgmr.msra.gmra.mrb[16].mxu1 %vm105_vm0, %v2925_v45 }
 0x184   :  { %2515 = vmatpush3.bf16.msra.mxu1 %v1398_v5  ;;  %2520 = vmatprep.subr.bf16.mxu0 %v1776_v31 }
 0x185   :  { %2538 = vmatprep.subr.bf16.mxu1 %v1782_v32  ;;  %2498 = vmatprep.mubr.msk.bf16.mxu0 %vm105_vm0, %v2938_v60 }
 0x186   :  { %2516 = vmatprep.mubr.msk.bf16.mxu1 %vm105_vm0, %v2938_v60 }
 0x18e   :  { %2499 = vmatmul.mubr.msk.bf16.vlgmr.msra.gmra.mrb[16].mxu0 %vm105_vm0, %v2951_v63 }
 0x18f   :  { %2517 = vmatmul.mubr.msk.bf16.vlgmr.msra.gmra.mrb[16].mxu1 %vm105_vm0, %v2951_v63  ;;  %2521 = vmatpush3.bf16.msra.mxu0 %v1776_v31 }
 0x190   :  { %2539 = vmatpush3.bf16.msra.mxu1 %v1782_v32  ;;  %2526 = vmatprep.subr.bf16.mxu0 %v1771_v20 }
 0x191   :  { %2544 = vmatprep.subr.bf16.mxu1 %v1777_v22  ;;  %2522 = vmatprep.mubr.msk.bf16.mxu0 %vm105_vm0, %v2900_v12 }
 0x192   :  { %2540 = vmatprep.mubr.msk.bf16.mxu1 %vm105_vm0, %v2900_v12 }
 0x196   :  { %2523 = vmatmul.mubr.msk.bf16.vlgmr.msra.gmra.mrb[20].mxu0 %vm105_vm0, %v2925_v45 }
 0x197   :  { %2527 = vmatpush3.bf16.msra.mxu0 %v1771_v20  ;;  %2541 = vmatmul.mubr.msk.bf16.vlgmr.msra.gmra.mrb[20].mxu1 %vm105_vm0, %v2925_v45 }
 0x198   :  { %2545 = vmatpush3.bf16.msra.mxu1 %v1777_v22  ;;  %2532 = vmatprep.subr.bf16.mxu0 %v1771_v20 }
 0x199   :  { %2550 = vmatprep.subr.bf16.mxu1 %v1777_v22  ;;  %2528 = vmatprep.mubr.msk.bf16.mxu0 %vm105_vm0, %v2900_v12 }
 0x19a   :  { %2546 = vmatprep.mubr.msk.bf16.mxu1 %vm105_vm0, %v2900_v12 }
 0x1a2   :  { %2529 = vmatmul.mubr.msk.bf16.vlgmr.msra.gmra.mrb[20].mxu0 %vm105_vm0, %v2925_v45 }
 0x1a3   :  { %2533 = vmatpush3.bf16.msra.mxu0 %v1771_v20  ;;  %2547 = vmatmul.mubr.msk.bf16.vlgmr.msra.gmra.mrb[20].mxu1 %vm105_vm0, %v2925_v45 }
 0x1a4   :  { %2551 = vmatpush3.bf16.msra.mxu1 %v1777_v22  ;;  %2534 = vmatprep.mubr.msk.bf16.mxu0 %vm105_vm0, %v2938_v60 }
 0x1a5   :  { %2552 = vmatprep.mubr.msk.bf16.mxu1 %vm105_vm0, %v2938_v60 }
 0x1ae   :  { %2535 = vmatmul.mubr.msk.bf16.vlgmr.msra.gmra.mrb[20].mxu0 %vm105_vm0, %v2951_v63 }
 0x1af   :  { %2553 = vmatmul.mubr.msk.bf16.vlgmr.msra.gmra.mrb[20].mxu1 %vm105_vm0, %v2951_v63 }
 0x221   :  { %v2428_v12 = vpop.f32.mrb[8].mxu0 }
 0x222   :  { %v2446_v33 = vpop.f32.mrb[8].mxu1  ;;  %v778_v34 = vpop.f32.mrb[9].mxu0 }
 0x223   :  { %v948_v35 = vsub.f32 %v778_v34, %v2446_v33  ;;  %v929_v36 = vpop.f32.mrb[9].mxu1  ;;  %v2429_v37 = vpop.f32.mrb[10].mxu0 }
 0x224   :  { %v950_v38 = vadd.f32 %v2428_v12, %v929_v36  ;;  %v2447_v39 = vpop.f32.mrb[10].mxu1  ;;  %v781_v40 = vpop.f32.mrb[11].mxu0 }
 0x225   :  { %v952_v41 = vmul.f32 %v948_v35, %v948_v35  ;;  %v949_v42 = vsub.f32 %v781_v40, %v2447_v39  ;;  %v932_v43 = vpop.f32.mrb[11].mxu1 }
 0x226   :  { %v954_v44 = vmul.f32 %v950_v38, %v950_v38  ;;  %v951_v45 = vadd.f32 %v2429_v37, %v932_v43 }
 0x227   :  { %v953_v46 = vmul.f32 %v949_v42, %v949_v42 }
 0x228   :  { %v3029_v47 = vadd.f32 %v954_v44, %v952_v41  ;;  %v955_v48 = vmul.f32 %v951_v45, %v951_v45 }
 0x22a   :  { %v3031_v49 = vadd.f32 %v955_v48, %v953_v46  ;;  %2689 = vrsqrt.f32 %v3029_v47  ;;  %vm960_vm1 = vcmp.eq.f32.partialorder %v3029_v47, inf  ;;  %v963_v53 = vand.u32 2147483648, %v3029_v47 }
 0x22b   :  { %vm962_vm2 = vcmp.eq.f32.partialorder %v3029_v47, 0.0 }
 0x22c   :  { %2691 = vrsqrt.f32 %v3031_v49  ;;  %vm967_vm3 = vcmp.eq.f32.partialorder %v3031_v49, inf  ;;  %v970_v57 = vand.u32 2147483648, %v3031_v49  ;;  %vm969_vm4 = vcmp.eq.f32.partialorder %v3031_v49, 0.0 }
 0x234   :  { %v2690_v50 = vpop.eup %2689 }
 0x235   :  { %v959_v51 = vmul.f32 %v2690_v50, %v3029_v47 }
 0x236   :  { %v2692_v52 = vpop.eup %2691 }
 0x237   :  { %v961_v54 = vsel %vm960_vm1, %v3029_v47, %v959_v51  ;;  %v966_v55 = vmul.f32 %v2692_v52, %v3031_v49 }
 0x238   :  { %v964_v56 = vsel %vm962_vm2, %v963_v53, %v961_v54 }
 0x239   :  { %v968_v58 = vsel %vm967_vm3, %v3031_v49, %v966_v55  ;;  %v972_v60 = vsel %vm105_vm0, %v964_v56, -inf }
 0x23a   :  { %v971_v59 = vsel %vm969_vm4, %v970_v57, %v968_v58 }
 0x23b   :  { %v973_v61 = vsel %vm105_vm0, %v971_v59, -inf }
 0x23c   :  { %v974_v62 = vmax.f32 %v972_v60, %v973_v61 }
 0x23e   :  { %975 = vmax.xlane.f32.xlu0 %v974_v62 }
 0x241   :  { %v2464_v63 = vpop.f32.mrb[12].mxu0 }
 0x242   :  { %v2482_v0 = vpop.f32.mrb[12].mxu1  ;;  %v1157_v1 = vpop.f32.mrb[13].mxu0 }
 0x243   :  { %v1308_v2 = vpop.f32.mrb[13].mxu1  ;;  %v1327_v3 = vsub.f32 %v1157_v1, %v2482_v0  ;;  %v2465_v5 = vpop.f32.mrb[14].mxu0 }
 0x244   :  { %v1329_v4 = vadd.f32 %v2464_v63, %v1308_v2  ;;  %v2483_v6 = vpop.f32.mrb[14].mxu1  ;;  %v1160_v7 = vpop.f32.mrb[15].mxu0 }
 0x245   :  { %v1311_v8 = vpop.f32.mrb[15].mxu1  ;;  %v1331_v9 = vmul.f32 %v1327_v3, %v1327_v3  ;;  %v1328_v11 = vsub.f32 %v1160_v7, %v2483_v6 }
 0x246   :  { %v1333_v10 = vmul.f32 %v1329_v4, %v1329_v4  ;;  %v1330_v13 = vadd.f32 %v2465_v5, %v1311_v8 }
 0x247   :  { %v1332_v15 = vmul.f32 %v1328_v11, %v1328_v11 }
 0x248   :  { %v3047_v14 = vadd.f32 %v1333_v10, %v1331_v9  ;;  %v1334_v16 = vmul.f32 %v1330_v13, %v1330_v13 }
 0x24a   :  { %v3049_v17 = vadd.f32 %v1334_v16, %v1332_v15  ;;  %2693 = vrsqrt.f32 %v3047_v14  ;;  %vm1339_vm5 = vcmp.eq.f32.partialorder %v3047_v14, inf  ;;  %v1342_v19 = vand.u32 2147483648, %v3047_v14 }
 0x24b   :  { %vm1341_vm6 = vcmp.eq.f32.partialorder %v3047_v14, 0.0 }
 0x24c   :  { %2695 = vrsqrt.f32 %v3049_v17  ;;  %vm1346_vm7 = vcmp.eq.f32.partialorder %v3049_v17, inf  ;;  %v1349_v22 = vand.u32 2147483648, %v3049_v17  ;;  %vm1348_vm8 = vcmp.eq.f32.partialorder %v3049_v17, 0.0 }
 0x254   :  { %v2694_v18 = vpop.eup %2693 }
 0x255   :  { %v1338_v20 = vmul.f32 %v2694_v18, %v3047_v14 }
 0x256   :  { %v2696_v21 = vpop.eup %2695 }
 0x257   :  { %v1340_v23 = vsel %vm1339_vm5, %v3047_v14, %v1338_v20  ;;  %v1345_v24 = vmul.f32 %v2696_v21, %v3049_v17 }
 0x258   :  { %v3062_v25 = vsel %vm1341_vm6, %v1342_v19, %v1340_v23 }
 0x259   :  { %v1347_v26 = vsel %vm1346_vm7, %v3049_v17, %v1345_v24  ;;  %v1351_v27 = vsel %vm105_vm0, %v3062_v25, -inf }
 0x25a   :  { %v3067_v28 = vsel %vm1348_vm8, %v1349_v22, %v1347_v26 }
 0x25b   :  { %v1352_v29 = vsel %vm105_vm0, %v3067_v28, -inf }
 0x25c   :  { %v1353_v30 = vmax.f32 %v1351_v27, %v1352_v29 }
 0x25e   :  { %1354 = vmax.xlane.f32.xlu1 %v1353_v30 }
 0x261   :  { %v2500_v51 = vpop.f32.mrb[16].mxu0 }
 0x262   :  { %v2518_v52 = vpop.f32.mrb[16].mxu1  ;;  %v1536_v53 = vpop.f32.mrb[17].mxu0 }
 0x263   :  { %v1687_v54 = vpop.f32.mrb[17].mxu1  ;;  %v1706_v55 = vsub.f32 %v1536_v53, %v2518_v52 }
 0x264   :  { %v1708_v57 = vadd.f32 %v2500_v51, %v1687_v54  ;;  %v2519_v58 = vpop.f32.mrb[18].mxu1 }
 0x265   :  { %v1690_v60 = vpop.f32.mrb[19].mxu1  ;;  %v1710_v61 = vmul.f32 %v1706_v55, %v1706_v55 }
 0x2cb   :  { %v976_v31 = vpop.xlane.xlu0 %975 }
 0x2cc   :  { %v977_v32 = vrot.slane %v976_v31, 4 }
 0x2ce   :  { %v978_v12 = vmax.f32 %v976_v31, %v977_v32 }
 0x2d0   :  { %v979_v33 = vrot.slane %v978_v12, 2 }
 0x2d2   :  { %v980_v34 = vmax.f32 %v978_v12, %v979_v33 }
 0x2d4   :  { %v981_v35 = vrot.slane %v980_v34, 1 }
 0x2d6   :  { %v982_v36 = vmax.f32 %v980_v34, %v981_v35 }
 0x2d8   :  { %2652 = vpush %v982_v36 }
 0x2eb   :  { %v1355_v19 = vpop.xlane.xlu1 %1354 }
 0x2ec   :  { %v1356_v20 = vrot.slane %v1355_v19, 4 }
 0x2ee   :  { %v1357_v21 = vmax.f32 %v1355_v19, %v1356_v20 }
 0x2f0   :  { %v1358_v22 = vrot.slane %v1357_v21, 2 }
 0x2f2   :  { %v1359_v27 = vmax.f32 %v1357_v21, %v1358_v22 }
 0x2f4   :  { %v1360_v31 = vrot.slane %v1359_v27, 1 }
 0x2f6   :  { %v1361_v33 = vmax.f32 %v1359_v27, %v1360_v31 }
 0x309   :  { %s2653_s1 = spop %2652 }
 0x30a   :  { %v984_v37 = vstv %s2653_s1 }
 0x30b   :  { %2697 = vrcp.f32 %v984_v37  ;;  %vm985_vm9 = vcmp.gt.f32.partialorder %v984_v37, 0.0 }
 0x315   :  { %v2698_v38 = vpop.eup %2697 }
 0x316   :  { %v987_v39 = vsel %vm985_vm9, %v2698_v38, 0.0 }
 0x317   :  { %v988_v40 = vmul.f32 %v987_v39, %v964_v56  ;;  %v989_v41 = vmul.f32 %v987_v39, %v971_v59  ;;  %v2501_v56 = vpop.f32.mrb[18].mxu0 }
 0x318   :  { %v1539_v59 = vpop.f32.mrb[19].mxu0 }
 0x319   :  { %v990_v42 = vmin.f32 %v988_v40, 1.0  ;;  %v991_v43 = vmin.f32 %v989_v41, 1.0  ;;  %v1707_v62 = vsub.f32 %v1539_v59, %v2519_v58 }
 0x31b   :  { %v992_v44 = vmul.f32 %v990_v42, %v3029_v47  ;;  %v993_v45 = vmul.f32 %v991_v43, %v3031_v49  ;;  %v1712_v47 = vmul.f32 %v1708_v57, %v1708_v57  ;;  %v1709_v49 = vadd.f32 %v2501_v56, %v1690_v60 }
 0x31c   :  { %v1711_v0 = vmul.f32 %v1707_v62, %v1707_v62 }
 0x31d   :  { %v994_v46 = vsel %vm105_vm0, %v992_v44, 0.0  ;;  %v995_v48 = vsel %vm105_vm0, %v993_v45, 0.0  ;;  %v3075_v63 = vadd.f32 %v1712_v47, %v1710_v61  ;;  %v1713_v1 = vmul.f32 %v1709_v49, %v1709_v49 }
 0x31e   :  { %v996_v50 = vadd.f32 %v995_v48, %v994_v46  ;;  %v2536_v46 = vpop.f32.mrb[20].mxu0  ;;  %v2554_v48 = vpop.f32.mrb[20].mxu1 }
 0x31f   :  { %v3077_v2 = vadd.f32 %v1713_v1, %v1711_v0  ;;  %2699 = vrsqrt.f32 %v3075_v63  ;;  %vm1718_vm10 = vcmp.eq.f32.partialorder %v3075_v63, inf  ;;  %v1721_v4 = vand.u32 2147483648, %v3075_v63  ;;  %v2066_v51 = vpop.f32.mrb[21].mxu1 }
 0x320   :  { %997 = vadd.xlane.f32.xlu0 %v996_v50  ;;  %vm1720_vm11 = vcmp.eq.f32.partialorder %v3075_v63, 0.0  ;;  %v1915_v50 = vpop.f32.mrb[21].mxu0 }
 0x321   :  { %2701 = vrsqrt.f32 %v3077_v2  ;;  %vm1725_vm12 = vcmp.eq.f32.partialorder %v3077_v2, inf  ;;  %v1728_v7 = vand.u32 2147483648, %v3077_v2  ;;  %vm1727_vm13 = vcmp.eq.f32.partialorder %v3077_v2, 0.0  ;;  %v2537_v53 = vpop.f32.mrb[22].mxu0 }
 0x322   :  { %v2085_v52 = vsub.f32 %v1915_v50, %v2554_v48  ;;  %v1918_v54 = vpop.f32.mrb[23].mxu0 }
 0x324   :  { %v2089_v57 = vmul.f32 %v2085_v52, %v2085_v52 }
 0x329   :  { %v2700_v3 = vpop.eup %2699 }
 0x32a   :  { %v1717_v5 = vmul.f32 %v2700_v3, %v3075_v63 }
 0x32b   :  { %v2702_v6 = vpop.eup %2701 }
 0x32c   :  { %v1719_v8 = vsel %vm1718_vm10, %v3075_v63, %v1717_v5  ;;  %v1724_v9 = vmul.f32 %v2702_v6, %v3077_v2 }
 0x32d   :  { %v3090_v10 = vsel %vm1720_vm11, %v1721_v4, %v1719_v8 }
 0x32e   :  { %v1726_v11 = vsel %vm1725_vm12, %v3077_v2, %v1724_v9  ;;  %v1730_v13 = vsel %vm105_vm0, %v3090_v10, -inf }
 0x32f   :  { %v3095_v15 = vsel %vm1727_vm13, %v1728_v7, %v1726_v11 }
 0x330   :  { %v1731_v16 = vsel %vm105_vm0, %v3095_v15, -inf }
 0x331   :  { %v1732_v18 = vmax.f32 %v1730_v13, %v1731_v16 }
 0x333   :  { %1733 = vmax.xlane.f32.xlu0 %v1732_v18 }
 0x3ad   :  { %v998_v23 = vpop.xlane.xlu0 %997 }
 0x3ae   :  { %v999_v24 = vrot.slane %v998_v23, 4 }
 0x3b0   :  { %v1000_v26 = vadd.f32 %v999_v24, %v998_v23 }
 0x3b2   :  { %v1001_v29 = vrot.slane %v1000_v26, 2 }
 0x3b4   :  { %v1002_v30 = vadd.f32 %v1001_v29, %v1000_v26 }
 0x3b6   :  { %v1003_v32 = vrot.slane %v1002_v30, 1 }
 0x3b8   :  { %v1004_v12 = vadd.f32 %v1003_v32, %v1002_v30 }
 0x3ba   :  { %2654 = vpush %v1004_v12 }
 0x3bb   :  { %2656 = vpush %v1361_v33 }
 0x3c0   :  { %v1734_v13 = vpop.xlane.xlu0 %1733 }
 0x3c1   :  { %v1735_v16 = vrot.slane %v1734_v13, 4 }
 0x3c3   :  { %v1736_v18 = vmax.f32 %v1734_v13, %v1735_v16 }
 0x3c5   :  { %v1737_v19 = vrot.slane %v1736_v18, 2 }
 0x3c7   :  { %v1738_v23 = vmax.f32 %v1736_v18, %v1737_v19 }
 0x3c9   :  { %v1739_v27 = vrot.slane %v1738_v23, 1 }
 0x3cb   :  { %v1740_v31 = vmax.f32 %v1738_v23, %v1739_v27 }
 0x3eb   :  { %s3099_s18 = spop %2654 }
 0x3ec   :  { %s2657_s19 = spop %2656 }
 0x3ed   :  { %v1363_v34 = vstv %s2657_s19 }
 0x3ee   :  { %2703 = vrcp.f32 %v1363_v34  ;;  %vm1364_vm14 = vcmp.gt.f32.partialorder %v1363_v34, 0.0 }
 0x3f8   :  { %v2704_v35 = vpop.eup %2703 }
 0x3f9   :  { %v1366_v36 = vsel %vm1364_vm14, %v2704_v35, 0.0 }
 0x3fa   :  { %v1367_v37 = vmul.f32 %v1366_v36, %v3062_v25  ;;  %v1368_v38 = vmul.f32 %v1366_v36, %v3067_v28  ;;  %v2087_v25 = vadd.f32 %v2536_v46, %v2066_v51  ;;  %v2555_v28 = vpop.f32.mrb[22].mxu1 }
 0x3fb   :  { %v2069_v55 = vpop.f32.mrb[23].mxu1  ;;  %v2086_v56 = vsub.f32 %v1918_v54, %v2555_v28 }
 0x3fc   :  { %v1369_v39 = vmin.f32 %v1367_v37, 1.0  ;;  %v1370_v40 = vmin.f32 %v1368_v38, 1.0 }
 0x3fd   :  { %v2090_v59 = vmul.f32 %v2086_v56, %v2086_v56 }
 0x3fe   :  { %v1371_v41 = vmul.f32 %v1369_v39, %v3047_v14  ;;  %v1372_v42 = vmul.f32 %v1370_v40, %v3049_v17  ;;  %v2091_v14 = vmul.f32 %v2087_v25, %v2087_v25  ;;  %v2088_v17 = vadd.f32 %v2537_v53, %v2069_v55 }
 0x400   :  { %v1373_v43 = vsel %vm105_vm0, %v1371_v41, 0.0  ;;  %v1374_v44 = vsel %vm105_vm0, %v1372_v42, 0.0  ;;  %v3107_v58 = vadd.f32 %v2091_v14, %v2089_v57  ;;  %v2092_v60 = vmul.f32 %v2088_v17, %v2088_v17 }
 0x401   :  { %v1375_v45 = vadd.f32 %v1374_v44, %v1373_v43 }
 0x402   :  { %v3109_v61 = vadd.f32 %v2092_v60, %v2090_v59  ;;  %2705 = vrsqrt.f32 %v3107_v58  ;;  %vm2097_vm15 = vcmp.eq.f32.partialorder %v3107_v58, inf  ;;  %v2100_v62 = vand.u32 2147483648, %v3107_v58 }
 0x403   :  { %1376 = vadd.xlane.f32.xlu1 %v1375_v45  ;;  %vm2099_vm1 = vcmp.eq.f32.partialorder %v3107_v58, 0.0 }
 0x404   :  { %2707 = vrsqrt.f32 %v3109_v61  ;;  %vm2104_vm2 = vcmp.eq.f32.partialorder %v3109_v61, inf  ;;  %v2107_v1 = vand.u32 2147483648, %v3109_v61  ;;  %vm2106_vm3 = vcmp.eq.f32.partialorder %v3109_v61, 0.0 }
 0x40c   :  { %v2706_v47 = vpop.eup %2705 }
 0x40d   :  { %v2096_v49 = vmul.f32 %v2706_v47, %v3107_v58 }
 0x40e   :  { %v2708_v0 = vpop.eup %2707 }
 0x40f   :  { %v2098_v3 = vsel %vm2097_vm15, %v3107_v58, %v2096_v49  ;;  %v2103_v4 = vmul.f32 %v2708_v0, %v3109_v61 }
 0x410   :  { %v3122_v5 = vsel %vm2099_vm1, %v2100_v62, %v2098_v3 }
 0x411   :  { %v2105_v6 = vsel %vm2104_vm2, %v3109_v61, %v2103_v4  ;;  %v2109_v7 = vsel %vm105_vm0, %v3122_v5, -inf }
 0x412   :  { %v3127_v8 = vsel %vm2106_vm3, %v2107_v1, %v2105_v6 }
 0x413   :  { %v2110_v9 = vsel %vm105_vm0, %v3127_v8, -inf }
 0x414   :  { %v2111_v11 = vmax.f32 %v2109_v7, %v2110_v9 }
 0x416   :  { %2112 = vmax.xlane.f32.xlu0 %v2111_v11 }
 0x490   :  { %v1377_v20 = vpop.xlane.xlu1 %1376 }
 0x491   :  { %v1378_v21 = vrot.slane %v1377_v20, 4 }
 0x493   :  { %v1379_v22 = vadd.f32 %v1378_v21, %v1377_v20 }
 0x495   :  { %v1380_v24 = vrot.slane %v1379_v22, 2 }
 0x497   :  { %v1381_v26 = vadd.f32 %v1380_v24, %v1379_v22 }
 0x499   :  { %v1382_v29 = vrot.slane %v1381_v26, 1 }
 0x49b   :  { %v1383_v30 = vadd.f32 %v1382_v29, %v1381_v26 }
 0x49d   :  { %2658 = vpush %v1383_v30 }
 0x49e   :  { %2660 = vpush %v1740_v31 }
 0x4a3   :  { %v2113_v43 = vpop.xlane.xlu0 %2112 }
 0x4a4   :  { %v2114_v44 = vrot.slane %v2113_v43, 4 }
 0x4a6   :  { %v2115_v45 = vmax.f32 %v2113_v43, %v2114_v44 }
 0x4ce   :  { %s3131_s20 = spop %2658 }
 0x4cf   :  { %s2661_s2 = spop %2660  ;;  %s1385_s21 = sadd.f32 %s3131_s20, %s3099_s18 }
 0x4d0   :  { %v1742_v32 = vstv %s2661_s2 }
 0x4d1   :  { %2709 = vrcp.f32 %v1742_v32  ;;  %vm1743_vm4 = vcmp.gt.f32.partialorder %v1742_v32, 0.0 }
 0x4db   :  { %v2710_v12 = vpop.eup %2709 }
 0x4dc   :  { %v1745_v33 = vsel %vm1743_vm4, %v2710_v12, 0.0 }
 0x4dd   :  { %v1746_v34 = vmul.f32 %v1745_v33, %v3090_v10  ;;  %v1747_v35 = vmul.f32 %v1745_v33, %v3095_v15  ;;  %v2116_v10 = vrot.slane %v2115_v45, 2 }
 0x4df   :  { %v1748_v36 = vmin.f32 %v1746_v34, 1.0  ;;  %v1749_v37 = vmin.f32 %v1747_v35, 1.0  ;;  %v2117_v50 = vmax.f32 %v2115_v45, %v2116_v10 }
 0x4e1   :  { %v1750_v38 = vmul.f32 %v1748_v36, %v3075_v63  ;;  %v1751_v39 = vmul.f32 %v1749_v37, %v3077_v2  ;;  %v2118_v52 = vrot.slane %v2117_v50, 1 }
 0x4e3   :  { %v1752_v40 = vsel %vm105_vm0, %v1750_v38, 0.0  ;;  %v1753_v41 = vsel %vm105_vm0, %v1751_v39, 0.0  ;;  %v2119_v53 = vmax.f32 %v2117_v50, %v2118_v52 }
 0x4e4   :  { %v1754_v42 = vadd.f32 %v1753_v41, %v1752_v40 }
 0x4e6   :  { %1755 = vadd.xlane.f32.xlu1 %v1754_v42 }
 0x573   :  { %v1756_v46 = vpop.xlane.xlu1 %1755 }
 0x574   :  { %v1757_v15 = vrot.slane %v1756_v46, 4 }
 0x576   :  { %v1758_v48 = vadd.f32 %v1757_v15, %v1756_v46 }
 0x578   :  { %v1759_v51 = vrot.slane %v1758_v48, 2 }
 0x57a   :  { %v1760_v63 = vadd.f32 %v1759_v51, %v1758_v48 }
 0x57c   :  { %v1761_v2 = vrot.slane %v1760_v63, 1 }
 0x57e   :  { %v1762_v25 = vadd.f32 %v1761_v2, %v1760_v63 }
 0x580   :  { %2662 = vpush %v1762_v25 }
 0x581   :  { %2664 = vpush %v2119_v53 }
 0x5b1   :  { %s2663_s22 = spop %2662 }
 0x5b2   :  { %s3141_s23 = sadd.f32 %s2663_s22, %s1385_s21  ;;  %s2665_s24 = spop %2664 }
 0x5b3   :  { %v2121_v28 = vstv %s2665_s24 }
 0x5b4   :  { %2711 = vrcp.f32 %v2121_v28  ;;  %vm2122_vm5 = vcmp.gt.f32.partialorder %v2121_v28, 0.0 }
 0x5be   :  { %v2712_v54 = vpop.eup %2711 }
 0x5bf   :  { %v2124_v55 = vsel %vm2122_vm5, %v2712_v54, 0.0 }
 0x5c0   :  { %v2125_v57 = vmul.f32 %v2124_v55, %v3122_v5  ;;  %v2126_v14 = vmul.f32 %v2124_v55, %v3127_v8 }
 0x5c2   :  { %v2127_v56 = vmin.f32 %v2125_v57, 1.0  ;;  %v2128_v17 = vmin.f32 %v2126_v14, 1.0 }
 0x5c4   :  { %v2129_v59 = vmul.f32 %v2127_v56, %v3107_v58  ;;  %v2130_v60 = vmul.f32 %v2128_v17, %v3109_v61 }
 0x5c6   :  { %v2131_v47 = vsel %vm105_vm0, %v2129_v59, 0.0  ;;  %v2132_v62 = vsel %vm105_vm0, %v2130_v60, 0.0 }
 0x5c7   :  { %v2133_v49 = vadd.f32 %v2132_v62, %v2131_v47 }
 0x5c9   :  { %2134 = vadd.xlane.f32.xlu1 %v2133_v49 }
 0x656   :  { %v2135_v0 = vpop.xlane.xlu1 %2134 }
 0x657   :  { %v2136_v1 = vrot.slane %v2135_v0, 4 }
 0x659   :  { %v2137_v3 = vadd.f32 %v2136_v1, %v2135_v0 }
 0x65b   :  { %v2138_v4 = vrot.slane %v2137_v3, 2 }
 0x65d   :  { %v2139_v5 = vadd.f32 %v2138_v4, %v2137_v3 }
 0x65f   :  { %v2140_v6 = vrot.slane %v2139_v5, 1 }
 0x661   :  { %v2141_v7 = vadd.f32 %v2140_v6, %v2139_v5 }
 0x663   :  { %2666 = vpush %v2141_v7 }
 0x694   :  { %s2667_s26 = spop %2666 }
 0x695   :  { %s2143_s27 = sadd.f32 %s2667_s26, %s3141_s23 }
 0x697   :  { %v2144_v58 = vstv %s2143_s27 }
 0x698   :  { %2145 = vst [vmem:[#allocation9] sm:$0xff] %v2144_v58 }
 0x699   :  { %2768 = shalt.err (!%p2765_p6)
}
 0x69a   :  { %s2769_s30 = scalar_lea.hbm %s3168_s6, 128 }
 0x69b   :  { %p2770_p7 = scmp.ne.s32.totalorder %s3168_s6, %s2769_s30  ;;  %p2773_p8 = scmp.lt.u32.totalorder %s2769_s30, %s3168_s6 }
 0x69d   :  { %p2775_p9 = pnand %p2773_p8, %p2770_p7 }
 0x69f   :  { %2778 = shalt.err (!%p2775_p9)
}
 0x6a0   :  { %2155 = dma.vmem_to_hbm [thread:$0]  %s2153_s3, 128, %s3168_s6, [#allocation6]  }
 0x6a1   :  { %2783 = dma.done.wait [#allocation6], 128  }
 0x6a2   :  { %2784 = vsyncadd [#allocation6], 4294967168 }
 0x6a3   :  { %2159 = vsyncpa [#allocation5], 1 }
 0x6a4   :  { %2160 = vsyncpa [#allocation8], 1 }
 0x6a5   :  { %2161 = vsyncpa [#allocation6], 1 }

</bundles_post_ra>
